<compile_context>
chip_gen: v5e
topology: v5e:2x2
jax: 0.10.0
libtpu: 0.0.40
codegen_flags: <defaults>
</compile_context>

<pallas_src>
import functools

import jax
import jax.numpy as jnp
from jax.experimental import pallas as pl
from jax.experimental.pallas import tpu as pltpu

# ---- static shapes implied by the module ------------------------------------
C_IN, C1, C2 = 13, 128, 256        # conv channels
K = 3                              # conv kernel size
L_IN = 42                          # ((42-2)//2 - 2)//2 = 9  ->  256*9 = 2304 = fc1 fan-in
L1 = L_IN - (K - 1)                # 40  (conv1 output length)
P1 = L1 // 2                       # 20  (after pool1)
L2 = P1 - (K - 1)                  # 18  (conv2 output length)
P2 = L2 // 2                       # 9   (after pool2)
FLAT = C2 * P2                     # 2304
H1, H2, OUT = 120, 84, 13
H1P, H2P, OUTP = 128, 128, 128     # lane-dense (padded) fc widths


# ---- fused kernel: conv/pool stack + MLP over one batch tile -----------------
def _generator_kernel(x_ref, w1_ref, b1_ref, w2_ref, b2_ref,
                      wf1_ref, bf1_ref, wf2_ref, bf2_ref, wf3_ref, bf3_ref,
                      o_ref):
    b = x_ref.shape[1]                              # batch tile (multiple of 8)
    x = x_ref[...]                                  # (L_IN, B, C_IN) f32

    # conv1 (valid, stride 1): K shifted MXU matmuls with M = L1*B
    acc1 = jnp.zeros((L1 * b, C1), jnp.float32)
    for k in range(K):
        acc1 += jnp.dot(x[k:k + L1].reshape(L1 * b, C_IN), w1_ref[k],
                        preferred_element_type=jnp.float32)
    h1 = jnp.maximum(acc1 + b1_ref[...], 0.0).reshape(P1, 2 * b, C1)
    # max-pool (window 2, stride 2) over length: rows l=2j / l=2j+1 are the two
    # B-wide sublane halves of each plane -> one vectorized maximum.
    p1 = jnp.maximum(h1[:, :b, :], h1[:, b:, :])    # (P1, B, C1) f32

    # conv2 (bf16 operands, f32 accumulation)
    acc2 = jnp.zeros((L2 * b, C2), jnp.float32)
    for k in range(K):
        lhs = p1[k:k + L2].reshape(L2 * b, C1).astype(jnp.bfloat16)
        acc2 += jnp.dot(lhs, w2_ref[k], preferred_element_type=jnp.float32)
    h2 = jnp.maximum(acc2 + b2_ref[...], 0.0).reshape(P2, 2 * b, C2)
    p2 = jnp.maximum(h2[:, :b, :], h2[:, b:, :])    # (P2, B, C2) f32

    # fc1: PyTorch's channel-major flatten is folded into wf1's row order, so
    # fc1 is P2 accumulated (B, C2) x (C2, H1P) matmuls on in-register features.
    h = jnp.zeros((b, H1P), jnp.float32)
    for p in range(P2):
        h += jnp.dot(p2[p].astype(jnp.bfloat16), wf1_ref[p],
                     preferred_element_type=jnp.float32)
    h = jnp.maximum(h + bf1_ref[...], 0.0).astype(jnp.bfloat16)

    h = jnp.dot(h, wf2_ref[...], preferred_element_type=jnp.float32) + bf2_ref[...]
    h = jnp.maximum(h, 0.0).astype(jnp.bfloat16)

    o_ref[...] = (jnp.dot(h, wf3_ref[...], preferred_element_type=jnp.float32)
                  + bf3_ref[...])                   # (B, OUTP) f32, full-lane store


# ---- wrapper -----------------------------------------------------------------
@functools.partial(jax.jit, static_argnames=("block_b",))
def generator_forward(x_ncl, params, block_b=8):
    assert block_b % 8 == 0
    n = x_ncl.shape[0]
    npad = ((n + block_b - 1) // block_b) * block_b

    # PyTorch (N, C, L) -> length-major (L, N, C); zero-pad batch to tile size.
    x_lnc = jnp.transpose(x_ncl, (2, 0, 1)).astype(jnp.float32)
    if npad != n:
        x_lnc = jnp.pad(x_lnc, ((0, 0), (0, npad - n), (0, 0)))

    grid = (npad // block_b,)
    out = pl.pallas_call(
        _generator_kernel,
        out_shape=jax.ShapeDtypeStruct((npad, OUTP), jnp.float32),
        grid_spec=pltpu.PrefetchScalarGridSpec(
            num_scalar_prefetch=0,
            grid=grid,
            in_specs=[
                pl.BlockSpec((L_IN, block_b, C_IN), lambda i: (0, i, 0)),
                pl.BlockSpec((K, C_IN, C1), lambda i: (0, 0, 0)),
                pl.BlockSpec((1, C1), lambda i: (0, 0)),
                pl.BlockSpec((K, C1, C2), lambda i: (0, 0, 0)),
                pl.BlockSpec((1, C2), lambda i: (0, 0)),
                pl.BlockSpec((P2, C2, H1P), lambda i: (0, 0, 0)),
                pl.BlockSpec((1, H1P), lambda i: (0, 0)),
                pl.BlockSpec((H1P, H2P), lambda i: (0, 0)),
                pl.BlockSpec((1, H2P), lambda i: (0, 0)),
                pl.BlockSpec((H2P, OUTP), lambda i: (0, 0)),
                pl.BlockSpec((1, OUTP), lambda i: (0, 0)),
            ],
            out_specs=pl.BlockSpec((block_b, OUTP), lambda i: (i, 0)),
        ),
        compiler_params=pltpu.CompilerParams(
            dimension_semantics=("parallel",)),
    )(x_lnc, params["w1"], params["b1"], params["w2"], params["b2"],
      params["wf1"], params["bf1"], params["wf2"], params["bf2"],
      params["wf3"], params["bf3"])

    return out[:n, :OUT]


# ---- convert PyTorch-layout f32 parameters to the kernel's layouts -----------
def convert_params(tp):
    # fc1: PyTorch flatten index f = c*P2 + p  ->  kernel uses [p, c, :] slabs.
    wf1 = tp["fc1_w"].reshape(H1, C2, P2)              # [o, c, p]
    wf1 = jnp.transpose(wf1, (2, 1, 0))                # [p, c, o]  (9, 256, 120)
    wf1 = jnp.pad(wf1, ((0, 0), (0, 0), (0, H1P - H1)))
    wf2 = jnp.pad(tp["fc2_w"].T, ((0, H1P - H1), (0, H2P - H2)))
    wf3 = jnp.pad(tp["fc3_w"].T, ((0, H2P - H2), (0, OUTP - OUT)))
    return {
        "w1": jnp.transpose(tp["conv1_w"], (2, 1, 0)).astype(jnp.float32),   # (K,13,128)
        "b1": tp["conv1_b"].reshape(1, C1).astype(jnp.float32),
        "w2": jnp.transpose(tp["conv2_w"], (2, 1, 0)).astype(jnp.bfloat16),  # (K,128,256)
        "b2": tp["conv2_b"].reshape(1, C2).astype(jnp.float32),
        "wf1": wf1.astype(jnp.bfloat16),                                     # (9,256,128)
        "bf1": jnp.pad(tp["fc1_b"], (0, H1P - H1)).reshape(1, H1P).astype(jnp.float32),
        "wf2": wf2.astype(jnp.bfloat16),                                     # (128,128)
        "bf2": jnp.pad(tp["fc2_b"], (0, H2P - H2)).reshape(1, H2P).astype(jnp.float32),
        "wf3": wf3.astype(jnp.bfloat16),                                     # (128,128)
        "bf3": jnp.pad(tp["fc3_b"], (0, OUTP - OUT)).reshape(1, OUTP).astype(jnp.float32),
    }


# ---- pure-JAX reference (PyTorch semantics, NCL layout, f32) -----------------
def reference_forward(x_ncl, tp):
    def conv1d(x, w, b):                      # x (N,C,L), w (O,C,K), b (O,)
        l_out = x.shape[2] - w.shape[2] + 1
        cols = [jnp.einsum("ncl,ocl->no", x[:, :, l:l + w.shape[2]], w)
                for l in range(l_out)]
        return jnp.stack(cols, axis=-1) + b[None, :, None]

    def maxpool1d(x):                         # window 2, stride 2 over L
        n, c, l = x.shape
        return x.reshape(n, c, l // 2, 2).max(axis=-1)

    h = maxpool1d(jax.nn.relu(conv1d(x_ncl, tp["conv1_w"], tp["conv1_b"])))
    h = maxpool1d(jax.nn.relu(conv1d(h, tp["conv2_w"], tp["conv2_b"])))
    h = h.reshape(h.shape[0], -1)                              # (N, 2304)
    h = jax.nn.relu(h @ tp["fc1_w"].T + tp["fc1_b"])
    h = jax.nn.relu(h @ tp["fc2_w"].T + tp["fc2_b"])
    return h @ tp["fc3_w"].T + tp["fc3_b"]


if __name__ == "__main__":
    key = jax.random.PRNGKey(0)
    ks = jax.random.split(key, 13)
    N = 16                                     # 2 batch tiles of 8

    x = jax.random.normal(ks[0], (N, C_IN, L_IN), jnp.float32)

    # deterministic synthetic parameters in PyTorch layouts
    tp = {
        "conv1_w": 0.05 * jax.random.normal(ks[1], (C1, C_IN, K), jnp.float32),
        "conv1_b": 0.05 * jax.random.normal(ks[2], (C1,), jnp.float32),
        "conv2_w": 0.05 * jax.random.normal(ks[3], (C2, C1, K), jnp.float32),
        "conv2_b": 0.05 * jax.random.normal(ks[4], (C2,), jnp.float32),
        "fc1_w": 0.05 * jax.random.normal(ks[5], (H1, FLAT), jnp.float32),
        "fc1_b": 0.05 * jax.random.normal(ks[6], (H1,), jnp.float32),
        "fc2_w": 0.05 * jax.random.normal(ks[7], (H2, H1), jnp.float32),
        "fc2_b": 0.05 * jax.random.normal(ks[8], (H2,), jnp.float32),
        "fc3_w": 0.05 * jax.random.normal(ks[9], (OUT, H2), jnp.float32),
        "fc3_b": 0.05 * jax.random.normal(ks[10], (OUT,), jnp.float32),
    }

    params = convert_params(tp)

    out = jax.block_until_ready(generator_forward(x, params, block_b=8))
    assert out.shape == (N, OUT) and out.dtype == jnp.float32

    ref = reference_forward(x, tp)
    if not bool(jnp.allclose(out, ref, atol=5e-2, rtol=5e-2)):
        raise AssertionError(
            f"mismatch vs reference, max abs diff = {float(jnp.max(jnp.abs(out - ref)))}")

    print("KERNEL_OK")
</pallas_src>

<mosaic_0001>
module attributes {stable_mosaic.version = 11 : i64} {
  func.func @_generator_kernel(%arg0: i32, %arg1: memref<42x8x13xf32, #tpu.memory_space<vmem>>, %arg2: memref<3x13x128xf32, #tpu.memory_space<vmem>>, %arg3: memref<1x128xf32, #tpu.memory_space<vmem>>, %arg4: memref<3x128x256xbf16, #tpu.memory_space<vmem>>, %arg5: memref<1x256xf32, #tpu.memory_space<vmem>>, %arg6: memref<9x256x128xbf16, #tpu.memory_space<vmem>>, %arg7: memref<1x128xf32, #tpu.memory_space<vmem>>, %arg8: memref<128x128xbf16, #tpu.memory_space<vmem>>, %arg9: memref<1x128xf32, #tpu.memory_space<vmem>>, %arg10: memref<128x128xbf16, #tpu.memory_space<vmem>>, %arg11: memref<1x128xf32, #tpu.memory_space<vmem>>, %arg12: memref<8x128xf32, #tpu.memory_space<vmem>>) attributes {dimension_semantics = [#tpu.dimension_semantics<parallel>], iteration_bounds = array<i64: 2>, scalar_prefetch = 0 : i64, scratch_operands = 0 : i64, tpu.core_type = #tpu.core_type<tc>, window_params = [{transform_indices = @transform_0, window_bounds = array<i64: 42, 8, 13>}, {pipeline_mode = #tpu.pipeline_mode<synchronous>, transform_indices = @transform_1, window_bounds = array<i64: 3, 13, 128>}, {pipeline_mode = #tpu.pipeline_mode<synchronous>, transform_indices = @transform_2, window_bounds = array<i64: 1, 128>}, {pipeline_mode = #tpu.pipeline_mode<synchronous>, transform_indices = @transform_3, window_bounds = array<i64: 3, 128, 256>}, {pipeline_mode = #tpu.pipeline_mode<synchronous>, transform_indices = @transform_4, window_bounds = array<i64: 1, 256>}, {pipeline_mode = #tpu.pipeline_mode<synchronous>, transform_indices = @transform_5, window_bounds = array<i64: 9, 256, 128>}, {pipeline_mode = #tpu.pipeline_mode<synchronous>, transform_indices = @transform_6, window_bounds = array<i64: 1, 128>}, {pipeline_mode = #tpu.pipeline_mode<synchronous>, transform_indices = @transform_7, window_bounds = array<i64: 128, 128>}, {pipeline_mode = #tpu.pipeline_mode<synchronous>, transform_indices = @transform_8, window_bounds = array<i64: 1, 128>}, {pipeline_mode = #tpu.pipeline_mode<synchronous>, transform_indices = @transform_9, window_bounds = array<i64: 128, 128>}, {pipeline_mode = #tpu.pipeline_mode<synchronous>, transform_indices = @transform_10, window_bounds = array<i64: 1, 128>}, {transform_indices = @transform_11, window_bounds = array<i64: 8, 128>}]} {
    %c0 = arith.constant 0 : index
    %c0_0 = arith.constant 0 : index
    %c0_1 = arith.constant 0 : index
    %0 = vector.load %arg1[%c0, %c0_0, %c0_1] : memref<42x8x13xf32, #tpu.memory_space<vmem>>, vector<42x8x13xf32>
    %cst = arith.constant 0.000000e+00 : f32
    %1 = vector.broadcast %cst : f32 to vector<320x128xf32>
    %2 = vector.extract_strided_slice %0 {offsets = [0, 0, 0], sizes = [40, 8, 13], strides = [1, 1, 1]} : vector<42x8x13xf32> to vector<40x8x13xf32>
    %3 = vector.shape_cast %2 : vector<40x8x13xf32> to vector<320x13xf32>
    %c0_2 = arith.constant 0 : index
    %c0_3 = arith.constant 0 : index
    %c0_4 = arith.constant 0 : index
    %4 = vector.load %arg2[%c0_2, %c0_3, %c0_4] : memref<3x13x128xf32, #tpu.memory_space<vmem>>, vector<1x13x128xf32>
    %5 = vector.shape_cast %4 : vector<1x13x128xf32> to vector<13x128xf32>
    %cst_5 = arith.constant dense<0.000000e+00> : vector<320x128xf32>
    %6 = tpu.matmul %3, %5, %cst_5 {dimension_numbers = #tpu.dot_dimension_numbers<[1], [0], [0], [1], [0, 0, 1, 1], [], []>} : vector<320x13xf32>, vector<13x128xf32>, vector<320x128xf32> -> vector<320x128xf32>
    %7 = arith.addf %1, %6 : vector<320x128xf32>
    %8 = vector.extract_strided_slice %0 {offsets = [1, 0, 0], sizes = [40, 8, 13], strides = [1, 1, 1]} : vector<42x8x13xf32> to vector<40x8x13xf32>
    %9 = vector.shape_cast %8 : vector<40x8x13xf32> to vector<320x13xf32>
    %c1 = arith.constant 1 : index
    %c0_6 = arith.constant 0 : index
    %c0_7 = arith.constant 0 : index
    %10 = vector.load %arg2[%c1, %c0_6, %c0_7] : memref<3x13x128xf32, #tpu.memory_space<vmem>>, vector<1x13x128xf32>
    %11 = vector.shape_cast %10 : vector<1x13x128xf32> to vector<13x128xf32>
    %cst_8 = arith.constant dense<0.000000e+00> : vector<320x128xf32>
    %12 = tpu.matmul %9, %11, %cst_8 {dimension_numbers = #tpu.dot_dimension_numbers<[1], [0], [0], [1], [0, 0, 1, 1], [], []>} : vector<320x13xf32>, vector<13x128xf32>, vector<320x128xf32> -> vector<320x128xf32>
    %13 = arith.addf %7, %12 : vector<320x128xf32>
    %14 = vector.extract_strided_slice %0 {offsets = [2, 0, 0], sizes = [40, 8, 13], strides = [1, 1, 1]} : vector<42x8x13xf32> to vector<40x8x13xf32>
    %15 = vector.shape_cast %14 : vector<40x8x13xf32> to vector<320x13xf32>
    %c2 = arith.constant 2 : index
    %c0_9 = arith.constant 0 : index
    %c0_10 = arith.constant 0 : index
    %16 = vector.load %arg2[%c2, %c0_9, %c0_10] : memref<3x13x128xf32, #tpu.memory_space<vmem>>, vector<1x13x128xf32>
    %17 = vector.shape_cast %16 : vector<1x13x128xf32> to vector<13x128xf32>
    %cst_11 = arith.constant dense<0.000000e+00> : vector<320x128xf32>
    %18 = tpu.matmul %15, %17, %cst_11 {dimension_numbers = #tpu.dot_dimension_numbers<[1], [0], [0], [1], [0, 0, 1, 1], [], []>} : vector<320x13xf32>, vector<13x128xf32>, vector<320x128xf32> -> vector<320x128xf32>
    %19 = arith.addf %13, %18 : vector<320x128xf32>
    %c0_12 = arith.constant 0 : index
    %c0_13 = arith.constant 0 : index
    %20 = vector.load %arg3[%c0_12, %c0_13] : memref<1x128xf32, #tpu.memory_space<vmem>>, vector<1x128xf32>
    %21 = vector.broadcast %20 : vector<1x128xf32> to vector<320x128xf32>
    %22 = arith.addf %19, %21 : vector<320x128xf32>
    %cst_14 = arith.constant 0.000000e+00 : f32
    %23 = vector.broadcast %cst_14 : f32 to vector<320x128xf32>
    %24 = arith.maximumf %22, %23 : vector<320x128xf32>
    %25 = vector.shape_cast %24 : vector<320x128xf32> to vector<20x16x128xf32>
    %26 = vector.extract_strided_slice %25 {offsets = [0, 0, 0], sizes = [20, 8, 128], strides = [1, 1, 1]} : vector<20x16x128xf32> to vector<20x8x128xf32>
    %27 = vector.extract_strided_slice %25 {offsets = [0, 8, 0], sizes = [20, 8, 128], strides = [1, 1, 1]} : vector<20x16x128xf32> to vector<20x8x128xf32>
    %28 = arith.maximumf %26, %27 : vector<20x8x128xf32>
    %cst_15 = arith.constant 0.000000e+00 : f32
    %29 = vector.broadcast %cst_15 : f32 to vector<144x256xf32>
    %30 = vector.extract_strided_slice %28 {offsets = [0, 0, 0], sizes = [18, 8, 128], strides = [1, 1, 1]} : vector<20x8x128xf32> to vector<18x8x128xf32>
    %31 = vector.shape_cast %30 : vector<18x8x128xf32> to vector<144x128xf32>
    %32 = arith.truncf %31 : vector<144x128xf32> to vector<144x128xbf16>
    %c0_16 = arith.constant 0 : index
    %c0_17 = arith.constant 0 : index
    %c0_18 = arith.constant 0 : index
    %33 = vector.load %arg4[%c0_16, %c0_17, %c0_18] : memref<3x128x256xbf16, #tpu.memory_space<vmem>>, vector<1x128x256xbf16>
    %34 = vector.shape_cast %33 : vector<1x128x256xbf16> to vector<128x256xbf16>
    %cst_19 = arith.constant dense<0.000000e+00> : vector<144x256xf32>
    %35 = tpu.matmul %32, %34, %cst_19 {dimension_numbers = #tpu.dot_dimension_numbers<[1], [0], [0], [1], [0, 0, 1, 1], [], []>} : vector<144x128xbf16>, vector<128x256xbf16>, vector<144x256xf32> -> vector<144x256xf32>
    %36 = arith.addf %29, %35 : vector<144x256xf32>
    %37 = vector.extract_strided_slice %28 {offsets = [1, 0, 0], sizes = [18, 8, 128], strides = [1, 1, 1]} : vector<20x8x128xf32> to vector<18x8x128xf32>
    %38 = vector.shape_cast %37 : vector<18x8x128xf32> to vector<144x128xf32>
    %39 = arith.truncf %38 : vector<144x128xf32> to vector<144x128xbf16>
    %c1_20 = arith.constant 1 : index
    %c0_21 = arith.constant 0 : index
    %c0_22 = arith.constant 0 : index
    %40 = vector.load %arg4[%c1_20, %c0_21, %c0_22] : memref<3x128x256xbf16, #tpu.memory_space<vmem>>, vector<1x128x256xbf16>
    %41 = vector.shape_cast %40 : vector<1x128x256xbf16> to vector<128x256xbf16>
    %cst_23 = arith.constant dense<0.000000e+00> : vector<144x256xf32>
    %42 = tpu.matmul %39, %41, %cst_23 {dimension_numbers = #tpu.dot_dimension_numbers<[1], [0], [0], [1], [0, 0, 1, 1], [], []>} : vector<144x128xbf16>, vector<128x256xbf16>, vector<144x256xf32> -> vector<144x256xf32>
    %43 = arith.addf %36, %42 : vector<144x256xf32>
    %44 = vector.extract_strided_slice %28 {offsets = [2, 0, 0], sizes = [18, 8, 128], strides = [1, 1, 1]} : vector<20x8x128xf32> to vector<18x8x128xf32>
    %45 = vector.shape_cast %44 : vector<18x8x128xf32> to vector<144x128xf32>
    %46 = arith.truncf %45 : vector<144x128xf32> to vector<144x128xbf16>
    %c2_24 = arith.constant 2 : index
    %c0_25 = arith.constant 0 : index
    %c0_26 = arith.constant 0 : index
    %47 = vector.load %arg4[%c2_24, %c0_25, %c0_26] : memref<3x128x256xbf16, #tpu.memory_space<vmem>>, vector<1x128x256xbf16>
    %48 = vector.shape_cast %47 : vector<1x128x256xbf16> to vector<128x256xbf16>
    %cst_27 = arith.constant dense<0.000000e+00> : vector<144x256xf32>
    %49 = tpu.matmul %46, %48, %cst_27 {dimension_numbers = #tpu.dot_dimension_numbers<[1], [0], [0], [1], [0, 0, 1, 1], [], []>} : vector<144x128xbf16>, vector<128x256xbf16>, vector<144x256xf32> -> vector<144x256xf32>
    %50 = arith.addf %43, %49 : vector<144x256xf32>
    %c0_28 = arith.constant 0 : index
    %c0_29 = arith.constant 0 : index
    %51 = vector.load %arg5[%c0_28, %c0_29] : memref<1x256xf32, #tpu.memory_space<vmem>>, vector<1x256xf32>
    %52 = vector.broadcast %51 : vector<1x256xf32> to vector<144x256xf32>
    %53 = arith.addf %50, %52 : vector<144x256xf32>
    %cst_30 = arith.constant 0.000000e+00 : f32
    %54 = vector.broadcast %cst_30 : f32 to vector<144x256xf32>
    %55 = arith.maximumf %53, %54 : vector<144x256xf32>
    %56 = vector.shape_cast %55 : vector<144x256xf32> to vector<9x16x256xf32>
    %57 = vector.extract_strided_slice %56 {offsets = [0, 0, 0], sizes = [9, 8, 256], strides = [1, 1, 1]} : vector<9x16x256xf32> to vector<9x8x256xf32>
    %58 = vector.extract_strided_slice %56 {offsets = [0, 8, 0], sizes = [9, 8, 256], strides = [1, 1, 1]} : vector<9x16x256xf32> to vector<9x8x256xf32>
    %59 = arith.maximumf %57, %58 : vector<9x8x256xf32>
    %cst_31 = arith.constant 0.000000e+00 : f32
    %60 = vector.broadcast %cst_31 : f32 to vector<8x128xf32>
    %61 = vector.extract_strided_slice %59 {offsets = [0, 0, 0], sizes = [1, 8, 256], strides = [1, 1, 1]} : vector<9x8x256xf32> to vector<1x8x256xf32>
    %62 = vector.shape_cast %61 : vector<1x8x256xf32> to vector<8x256xf32>
    %63 = arith.truncf %62 : vector<8x256xf32> to vector<8x256xbf16>
    %c0_32 = arith.constant 0 : index
    %c0_33 = arith.constant 0 : index
    %c0_34 = arith.constant 0 : index
    %64 = vector.load %arg6[%c0_32, %c0_33, %c0_34] : memref<9x256x128xbf16, #tpu.memory_space<vmem>>, vector<1x256x128xbf16>
    %65 = vector.shape_cast %64 : vector<1x256x128xbf16> to vector<256x128xbf16>
    %cst_35 = arith.constant dense<0.000000e+00> : vector<8x128xf32>
    %66 = tpu.matmul %63, %65, %cst_35 {dimension_numbers = #tpu.dot_dimension_numbers<[1], [0], [0], [1], [0, 0, 1, 1], [], []>} : vector<8x256xbf16>, vector<256x128xbf16>, vector<8x128xf32> -> vector<8x128xf32>
    %67 = arith.addf %60, %66 : vector<8x128xf32>
    %68 = vector.extract_strided_slice %59 {offsets = [1, 0, 0], sizes = [1, 8, 256], strides = [1, 1, 1]} : vector<9x8x256xf32> to vector<1x8x256xf32>
    %69 = vector.shape_cast %68 : vector<1x8x256xf32> to vector<8x256xf32>
    %70 = arith.truncf %69 : vector<8x256xf32> to vector<8x256xbf16>
    %c1_36 = arith.constant 1 : index
    %c0_37 = arith.constant 0 : index
    %c0_38 = arith.constant 0 : index
    %71 = vector.load %arg6[%c1_36, %c0_37, %c0_38] : memref<9x256x128xbf16, #tpu.memory_space<vmem>>, vector<1x256x128xbf16>
    %72 = vector.shape_cast %71 : vector<1x256x128xbf16> to vector<256x128xbf16>
    %cst_39 = arith.constant dense<0.000000e+00> : vector<8x128xf32>
    %73 = tpu.matmul %70, %72, %cst_39 {dimension_numbers = #tpu.dot_dimension_numbers<[1], [0], [0], [1], [0, 0, 1, 1], [], []>} : vector<8x256xbf16>, vector<256x128xbf16>, vector<8x128xf32> -> vector<8x128xf32>
    %74 = arith.addf %67, %73 : vector<8x128xf32>
    %75 = vector.extract_strided_slice %59 {offsets = [2, 0, 0], sizes = [1, 8, 256], strides = [1, 1, 1]} : vector<9x8x256xf32> to vector<1x8x256xf32>
    %76 = vector.shape_cast %75 : vector<1x8x256xf32> to vector<8x256xf32>
    %77 = arith.truncf %76 : vector<8x256xf32> to vector<8x256xbf16>
    %c2_40 = arith.constant 2 : index
    %c0_41 = arith.constant 0 : index
    %c0_42 = arith.constant 0 : index
    %78 = vector.load %arg6[%c2_40, %c0_41, %c0_42] : memref<9x256x128xbf16, #tpu.memory_space<vmem>>, vector<1x256x128xbf16>
    %79 = vector.shape_cast %78 : vector<1x256x128xbf16> to vector<256x128xbf16>
    %cst_43 = arith.constant dense<0.000000e+00> : vector<8x128xf32>
    %80 = tpu.matmul %77, %79, %cst_43 {dimension_numbers = #tpu.dot_dimension_numbers<[1], [0], [0], [1], [0, 0, 1, 1], [], []>} : vector<8x256xbf16>, vector<256x128xbf16>, vector<8x128xf32> -> vector<8x128xf32>
    %81 = arith.addf %74, %80 : vector<8x128xf32>
    %82 = vector.extract_strided_slice %59 {offsets = [3, 0, 0], sizes = [1, 8, 256], strides = [1, 1, 1]} : vector<9x8x256xf32> to vector<1x8x256xf32>
    %83 = vector.shape_cast %82 : vector<1x8x256xf32> to vector<8x256xf32>
    %84 = arith.truncf %83 : vector<8x256xf32> to vector<8x256xbf16>
    %c3 = arith.constant 3 : index
    %c0_44 = arith.constant 0 : index
    %c0_45 = arith.constant 0 : index
    %85 = vector.load %arg6[%c3, %c0_44, %c0_45] : memref<9x256x128xbf16, #tpu.memory_space<vmem>>, vector<1x256x128xbf16>
    %86 = vector.shape_cast %85 : vector<1x256x128xbf16> to vector<256x128xbf16>
    %cst_46 = arith.constant dense<0.000000e+00> : vector<8x128xf32>
    %87 = tpu.matmul %84, %86, %cst_46 {dimension_numbers = #tpu.dot_dimension_numbers<[1], [0], [0], [1], [0, 0, 1, 1], [], []>} : vector<8x256xbf16>, vector<256x128xbf16>, vector<8x128xf32> -> vector<8x128xf32>
    %88 = arith.addf %81, %87 : vector<8x128xf32>
    %89 = vector.extract_strided_slice %59 {offsets = [4, 0, 0], sizes = [1, 8, 256], strides = [1, 1, 1]} : vector<9x8x256xf32> to vector<1x8x256xf32>
    %90 = vector.shape_cast %89 : vector<1x8x256xf32> to vector<8x256xf32>
    %91 = arith.truncf %90 : vector<8x256xf32> to vector<8x256xbf16>
    %c4 = arith.constant 4 : index
    %c0_47 = arith.constant 0 : index
    %c0_48 = arith.constant 0 : index
    %92 = vector.load %arg6[%c4, %c0_47, %c0_48] : memref<9x256x128xbf16, #tpu.memory_space<vmem>>, vector<1x256x128xbf16>
    %93 = vector.shape_cast %92 : vector<1x256x128xbf16> to vector<256x128xbf16>
    %cst_49 = arith.constant dense<0.000000e+00> : vector<8x128xf32>
    %94 = tpu.matmul %91, %93, %cst_49 {dimension_numbers = #tpu.dot_dimension_numbers<[1], [0], [0], [1], [0, 0, 1, 1], [], []>} : vector<8x256xbf16>, vector<256x128xbf16>, vector<8x128xf32> -> vector<8x128xf32>
    %95 = arith.addf %88, %94 : vector<8x128xf32>
    %96 = vector.extract_strided_slice %59 {offsets = [5, 0, 0], sizes = [1, 8, 256], strides = [1, 1, 1]} : vector<9x8x256xf32> to vector<1x8x256xf32>
    %97 = vector.shape_cast %96 : vector<1x8x256xf32> to vector<8x256xf32>
    %98 = arith.truncf %97 : vector<8x256xf32> to vector<8x256xbf16>
    %c5 = arith.constant 5 : index
    %c0_50 = arith.constant 0 : index
    %c0_51 = arith.constant 0 : index
    %99 = vector.load %arg6[%c5, %c0_50, %c0_51] : memref<9x256x128xbf16, #tpu.memory_space<vmem>>, vector<1x256x128xbf16>
    %100 = vector.shape_cast %99 : vector<1x256x128xbf16> to vector<256x128xbf16>
    %cst_52 = arith.constant dense<0.000000e+00> : vector<8x128xf32>
    %101 = tpu.matmul %98, %100, %cst_52 {dimension_numbers = #tpu.dot_dimension_numbers<[1], [0], [0], [1], [0, 0, 1, 1], [], []>} : vector<8x256xbf16>, vector<256x128xbf16>, vector<8x128xf32> -> vector<8x128xf32>
    %102 = arith.addf %95, %101 : vector<8x128xf32>
    %103 = vector.extract_strided_slice %59 {offsets = [6, 0, 0], sizes = [1, 8, 256], strides = [1, 1, 1]} : vector<9x8x256xf32> to vector<1x8x256xf32>
    %104 = vector.shape_cast %103 : vector<1x8x256xf32> to vector<8x256xf32>
    %105 = arith.truncf %104 : vector<8x256xf32> to vector<8x256xbf16>
    %c6 = arith.constant 6 : index
    %c0_53 = arith.constant 0 : index
    %c0_54 = arith.constant 0 : index
    %106 = vector.load %arg6[%c6, %c0_53, %c0_54] : memref<9x256x128xbf16, #tpu.memory_space<vmem>>, vector<1x256x128xbf16>
    %107 = vector.shape_cast %106 : vector<1x256x128xbf16> to vector<256x128xbf16>
    %cst_55 = arith.constant dense<0.000000e+00> : vector<8x128xf32>
    %108 = tpu.matmul %105, %107, %cst_55 {dimension_numbers = #tpu.dot_dimension_numbers<[1], [0], [0], [1], [0, 0, 1, 1], [], []>} : vector<8x256xbf16>, vector<256x128xbf16>, vector<8x128xf32> -> vector<8x128xf32>
    %109 = arith.addf %102, %108 : vector<8x128xf32>
    %110 = vector.extract_strided_slice %59 {offsets = [7, 0, 0], sizes = [1, 8, 256], strides = [1, 1, 1]} : vector<9x8x256xf32> to vector<1x8x256xf32>
    %111 = vector.shape_cast %110 : vector<1x8x256xf32> to vector<8x256xf32>
    %112 = arith.truncf %111 : vector<8x256xf32> to vector<8x256xbf16>
    %c7 = arith.constant 7 : index
    %c0_56 = arith.constant 0 : index
    %c0_57 = arith.constant 0 : index
    %113 = vector.load %arg6[%c7, %c0_56, %c0_57] : memref<9x256x128xbf16, #tpu.memory_space<vmem>>, vector<1x256x128xbf16>
    %114 = vector.shape_cast %113 : vector<1x256x128xbf16> to vector<256x128xbf16>
    %cst_58 = arith.constant dense<0.000000e+00> : vector<8x128xf32>
    %115 = tpu.matmul %112, %114, %cst_58 {dimension_numbers = #tpu.dot_dimension_numbers<[1], [0], [0], [1], [0, 0, 1, 1], [], []>} : vector<8x256xbf16>, vector<256x128xbf16>, vector<8x128xf32> -> vector<8x128xf32>
    %116 = arith.addf %109, %115 : vector<8x128xf32>
    %117 = vector.extract_strided_slice %59 {offsets = [8, 0, 0], sizes = [1, 8, 256], strides = [1, 1, 1]} : vector<9x8x256xf32> to vector<1x8x256xf32>
    %118 = vector.shape_cast %117 : vector<1x8x256xf32> to vector<8x256xf32>
    %119 = arith.truncf %118 : vector<8x256xf32> to vector<8x256xbf16>
    %c8 = arith.constant 8 : index
    %c0_59 = arith.constant 0 : index
    %c0_60 = arith.constant 0 : index
    %120 = vector.load %arg6[%c8, %c0_59, %c0_60] : memref<9x256x128xbf16, #tpu.memory_space<vmem>>, vector<1x256x128xbf16>
    %121 = vector.shape_cast %120 : vector<1x256x128xbf16> to vector<256x128xbf16>
    %cst_61 = arith.constant dense<0.000000e+00> : vector<8x128xf32>
    %122 = tpu.matmul %119, %121, %cst_61 {dimension_numbers = #tpu.dot_dimension_numbers<[1], [0], [0], [1], [0, 0, 1, 1], [], []>} : vector<8x256xbf16>, vector<256x128xbf16>, vector<8x128xf32> -> vector<8x128xf32>
    %123 = arith.addf %116, %122 : vector<8x128xf32>
    %c0_62 = arith.constant 0 : index
    %c0_63 = arith.constant 0 : index
    %124 = vector.load %arg7[%c0_62, %c0_63] : memref<1x128xf32, #tpu.memory_space<vmem>>, vector<1x128xf32>
    %125 = vector.broadcast %124 : vector<1x128xf32> to vector<8x128xf32>
    %126 = arith.addf %123, %125 : vector<8x128xf32>
    %cst_64 = arith.constant 0.000000e+00 : f32
    %127 = vector.broadcast %cst_64 : f32 to vector<8x128xf32>
    %128 = arith.maximumf %126, %127 : vector<8x128xf32>
    %129 = arith.truncf %128 : vector<8x128xf32> to vector<8x128xbf16>
    %c0_65 = arith.constant 0 : index
    %c0_66 = arith.constant 0 : index
    %130 = vector.load %arg8[%c0_65, %c0_66] : memref<128x128xbf16, #tpu.memory_space<vmem>>, vector<128x128xbf16>
    %cst_67 = arith.constant dense<0.000000e+00> : vector<8x128xf32>
    %131 = tpu.matmul %129, %130, %cst_67 {dimension_numbers = #tpu.dot_dimension_numbers<[1], [0], [0], [1], [0, 0, 1, 1], [], []>} : vector<8x128xbf16>, vector<128x128xbf16>, vector<8x128xf32> -> vector<8x128xf32>
    %c0_68 = arith.constant 0 : index
    %c0_69 = arith.constant 0 : index
    %132 = vector.load %arg9[%c0_68, %c0_69] : memref<1x128xf32, #tpu.memory_space<vmem>>, vector<1x128xf32>
    %133 = vector.broadcast %132 : vector<1x128xf32> to vector<8x128xf32>
    %134 = arith.addf %131, %133 : vector<8x128xf32>
    %cst_70 = arith.constant 0.000000e+00 : f32
    %135 = vector.broadcast %cst_70 : f32 to vector<8x128xf32>
    %136 = arith.maximumf %134, %135 : vector<8x128xf32>
    %137 = arith.truncf %136 : vector<8x128xf32> to vector<8x128xbf16>
    %c0_71 = arith.constant 0 : index
    %c0_72 = arith.constant 0 : index
    %138 = vector.load %arg10[%c0_71, %c0_72] : memref<128x128xbf16, #tpu.memory_space<vmem>>, vector<128x128xbf16>
    %cst_73 = arith.constant dense<0.000000e+00> : vector<8x128xf32>
    %139 = tpu.matmul %137, %138, %cst_73 {dimension_numbers = #tpu.dot_dimension_numbers<[1], [0], [0], [1], [0, 0, 1, 1], [], []>} : vector<8x128xbf16>, vector<128x128xbf16>, vector<8x128xf32> -> vector<8x128xf32>
    %c0_74 = arith.constant 0 : index
    %c0_75 = arith.constant 0 : index
    %140 = vector.load %arg11[%c0_74, %c0_75] : memref<1x128xf32, #tpu.memory_space<vmem>>, vector<1x128xf32>
    %141 = vector.broadcast %140 : vector<1x128xf32> to vector<8x128xf32>
    %142 = arith.addf %139, %141 : vector<8x128xf32>
    %c0_76 = arith.constant 0 : index
    %c0_77 = arith.constant 0 : index
    %143 = vector.load %arg12[%c0_76, %c0_77] : memref<8x128xf32, #tpu.memory_space<vmem>>, vector<8x128xf32>
    tpu.vector_store %arg12[%c0_76, %c0_77], %142 {strides = array<i32>} : memref<8x128xf32, #tpu.memory_space<vmem>>, vector<8x128xf32>,
    return
  }
  func.func @transform_0(%arg0: i32) -> (i32, i32, i32) {
    %c0_i32 = arith.constant 0 : i32
    %c0_i32_0 = arith.constant 0 : i32
    %c0_i32_1 = arith.constant 0 : i32
    return %c0_i32, %arg0, %c0_i32_0 : i32, i32, i32
  }
  func.func @transform_1(%arg0: i32) -> (i32, i32, i32) {
    %c0_i32 = arith.constant 0 : i32
    %c0_i32_0 = arith.constant 0 : i32
    %c0_i32_1 = arith.constant 0 : i32
    %c0_i32_2 = arith.constant 0 : i32
    return %c0_i32, %c0_i32_0, %c0_i32_1 : i32, i32, i32
  }
  func.func @transform_2(%arg0: i32) -> (i32, i32) {
    %c0_i32 = arith.constant 0 : i32
    %c0_i32_0 = arith.constant 0 : i32
    %c0_i32_1 = arith.constant 0 : i32
    return %c0_i32, %c0_i32_0 : i32, i32
  }
  func.func @transform_3(%arg0: i32) -> (i32, i32, i32) {
    %c0_i32 = arith.constant 0 : i32
    %c0_i32_0 = arith.constant 0 : i32
    %c0_i32_1 = arith.constant 0 : i32
    %c0_i32_2 = arith.constant 0 : i32
    return %c0_i32, %c0_i32_0, %c0_i32_1 : i32, i32, i32
  }
  func.func @transform_4(%arg0: i32) -> (i32, i32) {
    %c0_i32 = arith.constant 0 : i32
    %c0_i32_0 = arith.constant 0 : i32
    %c0_i32_1 = arith.constant 0 : i32
    return %c0_i32, %c0_i32_0 : i32, i32
  }
  func.func @transform_5(%arg0: i32) -> (i32, i32, i32) {
    %c0_i32 = arith.constant 0 : i32
    %c0_i32_0 = arith.constant 0 : i32
    %c0_i32_1 = arith.constant 0 : i32
    %c0_i32_2 = arith.constant 0 : i32
    return %c0_i32, %c0_i32_0, %c0_i32_1 : i32, i32, i32
  }
  func.func @transform_6(%arg0: i32) -> (i32, i32) {
    %c0_i32 = arith.constant 0 : i32
    %c0_i32_0 = arith.constant 0 : i32
    %c0_i32_1 = arith.constant 0 : i32
    return %c0_i32, %c0_i32_0 : i32, i32
  }
  func.func @transform_7(%arg0: i32) -> (i32, i32) {
    %c0_i32 = arith.constant 0 : i32
    %c0_i32_0 = arith.constant 0 : i32
    %c0_i32_1 = arith.constant 0 : i32
    return %c0_i32, %c0_i32_0 : i32, i32
  }
  func.func @transform_8(%arg0: i32) -> (i32, i32) {
    %c0_i32 = arith.constant 0 : i32
    %c0_i32_0 = arith.constant 0 : i32
    %c0_i32_1 = arith.constant 0 : i32
    return %c0_i32, %c0_i32_0 : i32, i32
  }
  func.func @transform_9(%arg0: i32) -> (i32, i32) {
    %c0_i32 = arith.constant 0 : i32
    %c0_i32_0 = arith.constant 0 : i32
    %c0_i32_1 = arith.constant 0 : i32
    return %c0_i32, %c0_i32_0 : i32, i32
  }
  func.func @transform_10(%arg0: i32) -> (i32, i32) {
    %c0_i32 = arith.constant 0 : i32
    %c0_i32_0 = arith.constant 0 : i32
    %c0_i32_1 = arith.constant 0 : i32
    return %c0_i32, %c0_i32_0 : i32, i32
  }
  func.func @transform_11(%arg0: i32) -> (i32, i32) {
    %c0_i32 = arith.constant 0 : i32
    %c0_i32_0 = arith.constant 0 : i32
    return %arg0, %c0_i32 : i32, i32
  }
}

</mosaic_0001>

<bundles_post_ra>
// kernel: generator_forward.1
= control target key start
LH: loop header
LB: loop body
LE: loop exit
PB: predicated region body
PF: predicated region fallthrough
CT: control target
= control target key end

     0   :  { %s6268_s0 = inlined_call_operand.vmem [shape: f32[42,16,13], index: 0, kind: input, shape index: {}]   ;;  %s6269_s1 = inlined_call_operand.vmem [shape: f32[3,13,128], index: 1, kind: input, shape index: {}]   ;;  %s6270_s2 = inlined_call_operand.vmem [shape: f32[1,128], index: 2, kind: input, shape index: {}]   ;;  %s6271_s3 = inlined_call_operand.vmem [shape: bf16[3,128,256], index: 3, kind: input, shape index: {}]   ;;  %s6272_s4 = inlined_call_operand.vmem [shape: f32[1,256], index: 4, kind: input, shape index: {}]   ;;  %s6273_s5 = inlined_call_operand.hbm [shape: bf16[9,256,128], index: 5, kind: input, shape index: {}]   ;;  %s6274_s6 = inlined_call_operand.vmem [shape: f32[1,128], index: 6, kind: input, shape index: {}]   ;;  %s6275_s7 = inlined_call_operand.vmem [shape: bf16[128,128], index: 7, kind: input, shape index: {}]   ;;  %s6276_s8 = inlined_call_operand.vmem [shape: f32[1,128], index: 8, kind: input, shape index: {}]   ;;  %s6277_s9 = inlined_call_operand.vmem [shape: bf16[128,128], index: 9, kind: input, shape index: {}]   ;;  %s6278_s10 = inlined_call_operand.vmem [shape: f32[1,128], index: 10, kind: input, shape index: {}]   ;;  %s6279_s11 = inlined_call_operand.hbm [shape: f32[16,128], index: 11, kind: output, shape index: {}]  }
   0x1   :  { %6280 = sst [smem:[#allocation10_spill]] %s6268_s0 }
   0x2   :  { %6281 = sst [smem:[#allocation11_spill]] %s6273_s5 }
   0x3   :  { %16 = vsyncpa [#allocation4], 0 }
   0x4   :  { %17 = vsyncpa [#allocation5], 0 }
   0x5   :  { %19 = vsyncpa [#allocation5 + $0x1], 0  ;;  %s5223_s17 = smov 0   ;;  %s5225_s18 = smov 0  }
   0x6   :  { %s5227_s19 = smov 0   ;;  %s5229_s20 = smov 0  }
   0x7 LB: > { %s5244_s21 = sadd.s32 4294967295, %s5158_s20   ;;  %s3792_s22 = sadd.s32 4294967294, %s5158_s20   ;;  %s5158_s20 = sphi %s5229_s20, %s6293_s20   ;;  %s5154_s19 = sphi %s5227_s19, %s6292_s19   ;;  %s5150_s18 = sphi %s5225_s18, %s6291_s18   ;;  %s5146_s17 = sphi %s5223_s17, %s6290_s17  }
   0x8   : > { %s5248_s23 = sadd.s32 1, %s5158_s20   ;;  %s32_s24 = sadd.s32 1, %s5154_s19 }
   0x9   : > { %s29_s25 = ssub.s32 %s5158_s20, %s5248_s23  ;;  %p39_p0 = scmp.ne.s32.totalorder %s5154_s19, %s5150_s18 }
   0xa   : > { %p30_p1 = scmp.eq.s32.totalorder %s29_s25, 0  ;;  %p40_p2 = scmp.eq.s32.totalorder %s5158_s20, 0 }
   0xb   : > { %p279_p3 = scmp.eq.s32.totalorder %s5244_s21, 1  ;;  %p284_p4 = scmp.ne.s32.totalorder %s5150_s18, %s5146_s17 }
   0xc   : > { %s5260_s26 = scalar_select %p30_p1, %s5154_s19, %s32_s24  }
   0xd   : > { %p5262_p5 = por %p40_p2, %p39_p0  ;;  %p5266_p6 = por %p279_p3, %p39_p0 }
   0xe   : > { %6282 = sst [smem:[#allocation9_spill]] %s5260_s26  ;;  %p285_p7 = scmp.eq.s32.totalorder %s3792_s22, 1 }
   0xf   : > { %p3793_p8 = scmp.ge.s32.totalorder %s5158_s20, 1  ;;  %p292_p9 = scmp.lt.s32.totalorder %s5158_s20, 3 }
  0x10   : > { %p5272_p10 = por %p285_p7, %p284_p4  ;;  %p5019_p11 = scmp.eq.s32.totalorder %s5244_s21, 0 }
  0x11   : > { %p5277_p12 = pnand %p3793_p8, %p292_p9  ;;  %s6287_s5 = sld [smem:[#allocation11_spill]] }
  0x12   : > { %s5160_s15 = smov [#allocation3]   ;;  %s5161_s22 = smov 64  }
  0x13   : > { %p5011_p13 = pneg %p5277_p12  ;;  %s317_s16 = sshll.u32 %s5160_s15, 4  ;;  %s318_s16 = int_to_ptr.vmem [resolvable:$true] %s317_s16 }
  0x14   : > { %s5162_s24 = smov 4   ;;  %p3795_p1 = scmp.ge.s32.totalorder %s5158_s20, 2 }
  0x15   : > { %p5012_p0 = pnand %p5019_p11, %p5011_p13 }
  0x16   : > { %342 = sbr.rel (%p3795_p1) target bundleno = 79 (0x4f), region = 56 }
  0x17   : > { %s315_s14 = sshll.u32 %s6287_s5, 4  ;;  %s316_s14 = int_to_ptr.hbm [resolvable:$true] %s315_s14 }
  0x18   : > { %5014 = dma.hbm_to_vmem [thread:$0]  (!%p5012_p0), %s316_s14, 18432, %s318_s16, [#allocation4], %s5161_s22, %s5161_s22, %s5162_s24  }
  0x1b   : > { %345 = sbr.rel (!%p5262_p5) target bundleno = 79 (0x4f), region = 60  ;;  %s347_s25 = sand.u32 (%p5262_p5), 1, %s5154_s19  }
  0x1c   : > { %s3796_s12 = sshll.u32 (%p5262_p5), %s5158_s20, 3  ;;  %s5003_s13 = smul.u32 (%p5262_p5), 336, %s347_s25 }
  0x1d   : > { %s6288_s0 = sld [smem:[#allocation10_spill]] (%p5262_p5) }
  0x1e   : > { %s5303_s27 = scalar_lea.vmem (%p5262_p5), [#allocation2], %s5003_s13 }
  0x23   : > { %s5298_s26 = scalar_lea.vmem %s6288_s0, %s3796_s12 }
  0x24   : > { %v462_v0 = vld [vmem:[%s5298_s26] sm:$0xff]  ;;  %v464_v1 = vld [vmem:[%s5298_s26 + $0x10] sm:$0xff] }
  0x25   : > { %v466_v2 = vld [vmem:[%s5298_s26 + $0x20] sm:$0xff]  ;;  %463 = vst [vmem:[%s5303_s27] sm:$0xff] %v462_v0  ;;  %v468_v3 = vld [vmem:[%s5298_s26 + $0x30] sm:$0xff] }
  0x26   : > { %465 = vst [vmem:[%s5303_s27 + $0x8] sm:$0xff] %v464_v1  ;;  %v470_v4 = vld [vmem:[%s5298_s26 + $0x40] sm:$0xff]  ;;  %v472_v5 = vld [vmem:[%s5298_s26 + $0x50] sm:$0xff] }
  0x27   : > { %467 = vst [vmem:[%s5303_s27 + $0x10] sm:$0xff] %v466_v2  ;;  %v474_v6 = vld [vmem:[%s5298_s26 + $0x60] sm:$0xff]  ;;  %v476_v7 = vld [vmem:[%s5298_s26 + $0x70] sm:$0xff] }
  0x28   : > { %469 = vst [vmem:[%s5303_s27 + $0x18] sm:$0xff] %v468_v3  ;;  %v478_v8 = vld [vmem:[%s5298_s26 + $0x80] sm:$0xff]  ;;  %v480_v9 = vld [vmem:[%s5298_s26 + $0x90] sm:$0xff] }
  0x29   : > { %471 = vst [vmem:[%s5303_s27 + $0x20] sm:$0xff] %v470_v4  ;;  %v482_v10 = vld [vmem:[%s5298_s26 + $0xa0] sm:$0xff]  ;;  %v484_v11 = vld [vmem:[%s5298_s26 + $0xb0] sm:$0xff] }
  0x2a   : > { %473 = vst [vmem:[%s5303_s27 + $0x28] sm:$0xff] %v472_v5  ;;  %v486_v12 = vld [vmem:[%s5298_s26 + $0xc0] sm:$0xff]  ;;  %v488_v13 = vld [vmem:[%s5298_s26 + $0xd0] sm:$0xff] }
  0x2b   : > { %475 = vst [vmem:[%s5303_s27 + $0x30] sm:$0xff] %v474_v6  ;;  %v490_v14 = vld [vmem:[%s5298_s26 + $0xe0] sm:$0xff]  ;;  %v492_v15 = vld [vmem:[%s5298_s26 + $0xf0] sm:$0xff] }
  0x2c   : > { %477 = vst [vmem:[%s5303_s27 + $0x38] sm:$0xff] %v476_v7  ;;  %v494_v16 = vld [vmem:[%s5298_s26 + $0x100] sm:$0xff]  ;;  %v496_v17 = vld [vmem:[%s5298_s26 + $0x110] sm:$0xff] }
  0x2d   : > { %479 = vst [vmem:[%s5303_s27 + $0x40] sm:$0xff] %v478_v8  ;;  %v498_v18 = vld [vmem:[%s5298_s26 + $0x120] sm:$0xff]  ;;  %v500_v19 = vld [vmem:[%s5298_s26 + $0x130] sm:$0xff] }
  0x2e   : > { %481 = vst [vmem:[%s5303_s27 + $0x48] sm:$0xff] %v480_v9  ;;  %v502_v20 = vld [vmem:[%s5298_s26 + $0x140] sm:$0xff]  ;;  %v504_v21 = vld [vmem:[%s5298_s26 + $0x150] sm:$0xff] }
  0x2f   : > { %483 = vst [vmem:[%s5303_s27 + $0x50] sm:$0xff] %v482_v10  ;;  %v506_v22 = vld [vmem:[%s5298_s26 + $0x160] sm:$0xff]  ;;  %v508_v23 = vld [vmem:[%s5298_s26 + $0x170] sm:$0xff] }
  0x30   : > { %485 = vst [vmem:[%s5303_s27 + $0x58] sm:$0xff] %v484_v11  ;;  %v510_v24 = vld [vmem:[%s5298_s26 + $0x180] sm:$0xff]  ;;  %v512_v25 = vld [vmem:[%s5298_s26 + $0x190] sm:$0xff] }
  0x31   : > { %487 = vst [vmem:[%s5303_s27 + $0x60] sm:$0xff] %v486_v12  ;;  %v514_v26 = vld [vmem:[%s5298_s26 + $0x1a0] sm:$0xff]  ;;  %v516_v27 = vld [vmem:[%s5298_s26 + $0x1b0] sm:$0xff] }
  0x32   : > { %489 = vst [vmem:[%s5303_s27 + $0x68] sm:$0xff] %v488_v13  ;;  %v518_v28 = vld [vmem:[%s5298_s26 + $0x1c0] sm:$0xff]  ;;  %v520_v29 = vld [vmem:[%s5298_s26 + $0x1d0] sm:$0xff] }
  0x33   : > { %491 = vst [vmem:[%s5303_s27 + $0x70] sm:$0xff] %v490_v14  ;;  %v522_v30 = vld [vmem:[%s5298_s26 + $0x1e0] sm:$0xff]  ;;  %v524_v31 = vld [vmem:[%s5298_s26 + $0x1f0] sm:$0xff] }
  0x34   : > { %493 = vst [vmem:[%s5303_s27 + $0x78] sm:$0xff] %v492_v15  ;;  %v526_v32 = vld [vmem:[%s5298_s26 + $0x200] sm:$0xff]  ;;  %v528_v33 = vld [vmem:[%s5298_s26 + $0x210] sm:$0xff] }
  0x35   : > { %495 = vst [vmem:[%s5303_s27 + $0x80] sm:$0xff] %v494_v16  ;;  %v530_v34 = vld [vmem:[%s5298_s26 + $0x220] sm:$0xff]  ;;  %v532_v35 = vld [vmem:[%s5298_s26 + $0x230] sm:$0xff] }
  0x36   : > { %497 = vst [vmem:[%s5303_s27 + $0x88] sm:$0xff] %v496_v17  ;;  %v534_v36 = vld [vmem:[%s5298_s26 + $0x240] sm:$0xff]  ;;  %v536_v37 = vld [vmem:[%s5298_s26 + $0x250] sm:$0xff] }
  0x37   : > { %499 = vst [vmem:[%s5303_s27 + $0x90] sm:$0xff] %v498_v18  ;;  %v538_v38 = vld [vmem:[%s5298_s26 + $0x260] sm:$0xff]  ;;  %v540_v39 = vld [vmem:[%s5298_s26 + $0x270] sm:$0xff] }
  0x38   : > { %501 = vst [vmem:[%s5303_s27 + $0x98] sm:$0xff] %v500_v19  ;;  %v542_v40 = vld [vmem:[%s5298_s26 + $0x280] sm:$0xff]  ;;  %v544_v41 = vld [vmem:[%s5298_s26 + $0x290] sm:$0xff] }
  0x39   : > { %503 = vst [vmem:[%s5303_s27 + $0xa0] sm:$0xff] %v502_v20 }
  0x3a   : > { %505 = vst [vmem:[%s5303_s27 + $0xa8] sm:$0xff] %v504_v21 }
  0x3b   : > { %507 = vst [vmem:[%s5303_s27 + $0xb0] sm:$0xff] %v506_v22 }
  0x3c   : > { %509 = vst [vmem:[%s5303_s27 + $0xb8] sm:$0xff] %v508_v23 }
  0x3d   : > { %511 = vst [vmem:[%s5303_s27 + $0xc0] sm:$0xff] %v510_v24 }
  0x3e   : > { %513 = vst [vmem:[%s5303_s27 + $0xc8] sm:$0xff] %v512_v25 }
  0x3f   : > { %515 = vst [vmem:[%s5303_s27 + $0xd0] sm:$0xff] %v514_v26 }
  0x40   : > { %517 = vst [vmem:[%s5303_s27 + $0xd8] sm:$0xff] %v516_v27 }
  0x41   : > { %519 = vst [vmem:[%s5303_s27 + $0xe0] sm:$0xff] %v518_v28 }
  0x42   : > { %521 = vst [vmem:[%s5303_s27 + $0xe8] sm:$0xff] %v520_v29 }
  0x43   : > { %523 = vst [vmem:[%s5303_s27 + $0xf0] sm:$0xff] %v522_v30 }
  0x44   : > { %525 = vst [vmem:[%s5303_s27 + $0xf8] sm:$0xff] %v524_v31 }
  0x45   : > { %527 = vst [vmem:[%s5303_s27 + $0x100] sm:$0xff] %v526_v32 }
  0x46   : > { %529 = vst [vmem:[%s5303_s27 + $0x108] sm:$0xff] %v528_v33 }
  0x47   : > { %531 = vst [vmem:[%s5303_s27 + $0x110] sm:$0xff] %v530_v34 }
  0x48   : > { %533 = vst [vmem:[%s5303_s27 + $0x118] sm:$0xff] %v532_v35 }
  0x49   : > { %535 = vst [vmem:[%s5303_s27 + $0x120] sm:$0xff] %v534_v36 }
  0x4a   : > { %537 = vst [vmem:[%s5303_s27 + $0x128] sm:$0xff] %v536_v37 }
  0x4b   : > { %539 = vst [vmem:[%s5303_s27 + $0x130] sm:$0xff] %v538_v38 }
  0x4c   : > { %541 = vst [vmem:[%s5303_s27 + $0x138] sm:$0xff] %v540_v39 }
  0x4d   : > { %543 = vst [vmem:[%s5303_s27 + $0x140] sm:$0xff] %v542_v40 }
  0x4e   : > { %545 = vst [vmem:[%s5303_s27 + $0x148] sm:$0xff] %v544_v41 }
  0x4f PF: > { %554 = sbr.rel (%p5277_p12) target bundleno = 1383 (0x567), region = 98  ;;  %s5389_s5 = sand.u32 (!%p5277_p12), 1, %s5150_s18  }
  0x50   : > { %s5004_s14 = smul.u32 (!%p5277_p12), 336, %s5389_s5 }
  0x52   : > { %s5392_s16 = scalar_lea.vmem (!%p5277_p12), [#allocation2], %s5004_s14 }
  0x54   : > { %5137 = dma.done.wait (%p5019_p11), [#allocation4], 18432  }
  0x55   : > { %5139 = vsyncadd (%p5019_p11), [#allocation4], 4294948864  ;;  %vm769_vm0 = vcmask 1044480   ;;  %v3801_v42 = vld [vmem:[%s6269_s1 + $0x18] sm:$0x1f]  ;;  %v3800_v45 = vld [vmem:[%s6269_s1 + $0x10] sm:$0xff] }
  0x56   : > { %v644_v43 = vld [vmem:[%s6269_s1 + $0x8] sm:$0x1f]  ;;  %3802 = vmatpush.msk.msra.mxu0 %vm769_vm0, %v3801_v42  ;;  %v643_v46 = vld [vmem:[%s6269_s1] sm:$0xff]  ;;  %vm648_vm1 = vcmask 105472   ;;  %v4001_v1 = vld [vmem:[%s6271_s3 + $0xf0] sm:$0xf] }
  0x57   : > { %v3885_v44 = vld [vmem:[%s6269_s1 + $0x28] sm:$0x1f]  ;;  %3843 = vmatpush.msk.msra.mxu1 %vm769_vm0, %v644_v43  ;;  %v3884_v47 = vld [vmem:[%s6269_s1 + $0x20] sm:$0xff]  ;;  %v4826_v2 = vld [vmem:[%s6271_s3 + $0xf4] sm:$0xf0]  ;;  %s4792_s15 = sshll.u32 %s5244_s21, 3 }
  0x58   : > { %3886 = vmatpush.msk.msra.mxu2 %vm769_vm0, %v3885_v44  ;;  %v602_v48 = vld [vmem:[%s5392_s16 + $0x8] sm:$0xff]  ;;  %v601_v49 = vld [vmem:[%s5392_s16] sm:$0xff]  ;;  %v603_v50 = vld [vmem:[%s5392_s16 + $0x10] sm:$0xff]  ;;  %788 = vmatpush.msra.mxu0 %v3800_v45  ;;  %v4002_v4 = vor.u32 %v4826_v2, %v4001_v1  ;;  %s3799_s27 = sshll.u32 %s5389_s5, 3  ;;  %s3710_s30 = scalar_lea.hbm %s6279_s11, %s4792_s15 }
  0x59   : > { %931 = vmatpush.msra.mxu1 %v643_v46  ;;  %3803 = vmatmul.msk.f32.vlgmr.msra.gmra.mxu0 %vm648_vm1, %v602_v48  ;;  %v604_v51 = vld [vmem:[%s5392_s16 + $0x18] sm:$0xff]  ;;  %v605_v52 = vld [vmem:[%s5392_s16 + $0x20] sm:$0xff]  ;;  %v606_v53 = vld [vmem:[%s5392_s16 + $0x28] sm:$0xff]  ;;  %s3714_s12 = sshll.u32 %s3710_s30, 4  ;;  %s3700_s13 = scalar_lea.sflag [#allocation5], %s5389_s5  ;;  %s3715_s12 = int_to_ptr.hbm [resolvable:$true] %s3714_s12 }
  0x5a   : > { %1077 = vmatpush.msra.mxu2 %v3884_v47  ;;  %3844 = vmatmul.msk.f32.vlgmr.msra.gmra.mxu1 %vm648_vm1, %v601_v49  ;;  %v607_v54 = vld [vmem:[%s5392_s16 + $0x30] sm:$0xff]  ;;  %v608_v55 = vld [vmem:[%s5392_s16 + $0x38] sm:$0xff]  ;;  %v609_v56 = vld [vmem:[%s5392_s16 + $0x40] sm:$0xff]  ;;  %s5106_s21 = sshra.s32 %s3715_s12, 4  ;;  %s5112_s26 = scalar_lea.hbm %s6279_s11, 16  ;;  %s5107_s21 = int_to_ptr.hbm [resolvable:$true] %s5106_s21 }
  0x5b   : > { %3887 = vmatmul.msk.f32.vlgmr.msra.gmra.mxu2 %vm648_vm1, %v603_v50  ;;  %v610_v57 = vld [vmem:[%s5392_s16 + $0x48] sm:$0xff]  ;;  %v611_v58 = vld [vmem:[%s5392_s16 + $0x50] sm:$0xff]  ;;  %v612_v59 = vld [vmem:[%s5392_s16 + $0x58] sm:$0xff]  ;;  %1474 = vmatpush.bf16.msra.mxu3 %v4002_v4  ;;  %s5108_s0 = scalar_lea.hbm %s5107_s21, 8  ;;  %p5113_p5 = scmp.lt.s32.totalorder %s5107_s21, %s6279_s11 }
  0x5c   : > { %v613_v60 = vld [vmem:[%s5392_s16 + $0x60] sm:$0xff]  ;;  %v614_v61 = vld [vmem:[%s5392_s16 + $0x68] sm:$0xff]  ;;  %v615_v62 = vld [vmem:[%s5392_s16 + $0x70] sm:$0xff]  ;;  %p5109_p2 = scmp.ne.s32.totalorder %s5107_s21, %s5108_s0  ;;  %p5114_p7 = scmp.lt.s32.totalorder %s5112_s26, %s5108_s0 }
  0x5d   : > { %v616_v63 = vld [vmem:[%s5392_s16 + $0x78] sm:$0xff]  ;;  %v617_v0 = vld [vmem:[%s5392_s16 + $0x80] sm:$0xff]  ;;  %v618_v3 = vld [vmem:[%s5392_s16 + $0x88] sm:$0xff] }
  0x5e   : > { %v3993_v5 = vld [vmem:[%s6271_s3 + $0xe0] sm:$0xf]  ;;  %v4824_v6 = vld [vmem:[%s6271_s3 + $0xe4] sm:$0xf0]  ;;  %v3985_v9 = vld [vmem:[%s6271_s3 + $0xd0] sm:$0xf]  ;;  %p5110_p3 = pnand %p5109_p2, %p5266_p6  ;;  %p5115_p8 = por %p5114_p7, %p5113_p5 }
  0x5f   : > { %v3994_v7 = vor.u32 %v4824_v6, %v3993_v5  ;;  %v4822_v10 = vld [vmem:[%s6271_s3 + $0xd4] sm:$0xf0]  ;;  %v619_v12 = vld [vmem:[%s5392_s16 + $0x90] sm:$0xff]  ;;  %v4820_v15 = vld [vmem:[%s6271_s3 + $0xc4] sm:$0xf0] }
  0x60   : > { %v3986_v13 = vor.u32 %v4822_v10, %v3985_v9  ;;  %v3977_v14 = vld [vmem:[%s6271_s3 + $0xc0] sm:$0xf]  ;;  %v3969_v20 = vld [vmem:[%s6271_s3 + $0xb0] sm:$0xf]  ;;  %v4818_v21 = vld [vmem:[%s6271_s3 + $0xb4] sm:$0xf0]  ;;  %p5111_p4 = pneg %p5110_p3 }
  0x61   : > { %3804 = vmatmul.msk.f32.gmra.mxu0 %vm648_vm1, %v603_v50  ;;  %1475 = vmatpush.bf16.msra.mxu3 %v3994_v7  ;;  %v3978_v16 = vor.u32 %v4820_v15, %v3977_v14  ;;  %v620_v23 = vld [vmem:[%s5392_s16 + $0x98] sm:$0xff]  ;;  %v3970_v24 = vor.u32 %v4818_v21, %v3969_v20  ;;  %v5521_v26 = vld [vmem:[%s6270_s2] ss:$0 sm:$0xff]  ;;  %v3953_v35 = vld [vmem:[%s6271_s3 + $0x90] sm:$0xf] }
  0x62   : > { %3845 = vmatmul.msk.f32.gmra.mxu1 %vm648_vm1, %v602_v48  ;;  %v3961_v28 = vld [vmem:[%s6271_s3 + $0xa0] sm:$0xf]  ;;  %v4816_v29 = vld [vmem:[%s6271_s3 + $0xa4] sm:$0xf0]  ;;  %v4814_v36 = vld [vmem:[%s6271_s3 + $0x94] sm:$0xf0]  ;;  %p5116_p9 = pnand %p5115_p8, %p5111_p4 }
  0x63   : > { %3888 = vmatmul.msk.f32.gmra.mxu2 %vm648_vm1, %v604_v51  ;;  %v3962_v30 = vor.u32 %v4816_v29, %v3961_v28  ;;  %v621_v38 = vld [vmem:[%s5392_s16 + $0xa0] sm:$0xff]  ;;  %v3954_v39 = vor.u32 %v4814_v36, %v3953_v35  ;;  %v4812_v44 = vld [vmem:[%s6271_s3 + $0x84] sm:$0xf0] }
  0x64   : > { %v3945_v43 = vld [vmem:[%s6271_s3 + $0x80] sm:$0xf]  ;;  %v624_v5 = vld [vmem:[%s5392_s16 + $0xb8] sm:$0xff] }
  0x65   : > { %1476 = vmatpush.bf16.msra.mxu3 %v3986_v13  ;;  %v3946_v45 = vor.u32 %v4812_v44, %v3945_v43  ;;  %v625_v13 = vld [vmem:[%s5392_s16 + $0xc0] sm:$0xff] }
  0x69   : > { %3805 = vmatmul.msk.f32.gmra.mxu0 %vm648_vm1, %v604_v51  ;;  %1477 = vmatpush.bf16.msra.mxu3 %v3978_v16 }
  0x6a   : > { %3846 = vmatmul.msk.f32.gmra.mxu1 %vm648_vm1, %v603_v50 }
  0x6b   : > { %3889 = vmatmul.msk.f32.gmra.mxu2 %vm648_vm1, %v605_v52 }
  0x6d   : > { %1478 = vmatpush.bf16.msra.mxu3 %v3970_v24 }
  0x71   : > { %3806 = vmatmul.msk.f32.gmra.mxu0 %vm648_vm1, %v605_v52  ;;  %1479 = vmatpush.bf16.msra.mxu3 %v3962_v30 }
  0x72   : > { %3847 = vmatmul.msk.f32.gmra.mxu1 %vm648_vm1, %v604_v51  ;;  %v622_v51 = vld [vmem:[%s5392_s16 + $0xa8] sm:$0xff] }
  0x73   : > { %3890 = vmatmul.msk.f32.gmra.mxu2 %vm648_vm1, %v606_v53 }
  0x75   : > { %1480 = vmatpush.bf16.msra.mxu3 %v3954_v39 }
  0x79   : > { %3807 = vmatmul.msk.f32.gmra.mxu0 %vm648_vm1, %v606_v53  ;;  %1481 = vmatpush.bf16.msra.mxu3 %v3946_v45 }
  0x7a   : > { %3848 = vmatmul.msk.f32.gmra.mxu1 %vm648_vm1, %v605_v52 }
  0x7b   : > { %3891 = vmatmul.msk.f32.gmra.mxu2 %vm648_vm1, %v607_v54 }
  0x81   : > { %3808 = vmatmul.msk.f32.gmra.mxu0 %vm648_vm1, %v607_v54 }
  0x82   : > { %3849 = vmatmul.msk.f32.gmra.mxu1 %vm648_vm1, %v606_v53 }
  0x83   : > { %3892 = vmatmul.msk.f32.gmra.mxu2 %vm648_vm1, %v608_v55 }
  0x89   : > { %3809 = vmatmul.msk.f32.gmra.mxu0 %vm648_vm1, %v608_v55 }
  0x8a   : > { %3850 = vmatmul.msk.f32.gmra.mxu1 %vm648_vm1, %v607_v54 }
  0x8b   : > { %3893 = vmatmul.msk.f32.gmra.mxu2 %vm648_vm1, %v609_v56 }
  0x91   : > { %3810 = vmatmul.msk.f32.gmra.mxu0 %vm648_vm1, %v609_v56 }
  0x92   : > { %3851 = vmatmul.msk.f32.gmra.mxu1 %vm648_vm1, %v608_v55 }
  0x93   : > { %3894 = vmatmul.msk.f32.gmra.mxu2 %vm648_vm1, %v610_v57 }
  0x99   : > { %3811 = vmatmul.msk.f32.gmra.mxu0 %vm648_vm1, %v610_v57 }
  0x9a   : > { %3852 = vmatmul.msk.f32.gmra.mxu1 %vm648_vm1, %v609_v56 }
  0x9b   : > { %3895 = vmatmul.msk.f32.gmra.mxu2 %vm648_vm1, %v611_v58 }
  0xa1   : > { %3812 = vmatmul.msk.f32.gmra.mxu0 %vm648_vm1, %v611_v58 }
  0xa2   : > { %3853 = vmatmul.msk.f32.gmra.mxu1 %vm648_vm1, %v610_v57 }
  0xa3   : > { %3896 = vmatmul.msk.f32.gmra.mxu2 %vm648_vm1, %v612_v59 }
  0xa9   : > { %3813 = vmatmul.msk.f32.gmra.mxu0 %vm648_vm1, %v612_v59 }
  0xaa   : > { %3854 = vmatmul.msk.f32.gmra.mxu1 %vm648_vm1, %v611_v58 }
  0xab   : > { %3897 = vmatmul.msk.f32.gmra.mxu2 %vm648_vm1, %v613_v60 }
  0xb1   : > { %3814 = vmatmul.msk.f32.gmra.mxu0 %vm648_vm1, %v613_v60 }
  0xb2   : > { %3855 = vmatmul.msk.f32.gmra.mxu1 %vm648_vm1, %v612_v59  ;;  %v623_v59 = vld [vmem:[%s5392_s16 + $0xb0] sm:$0xff] }
  0xb3   : > { %3898 = vmatmul.msk.f32.gmra.mxu2 %vm648_vm1, %v614_v61 }
  0xb9   : > { %3815 = vmatmul.msk.f32.gmra.mxu0 %vm648_vm1, %v614_v61 }
  0xba   : > { %3856 = vmatmul.msk.f32.gmra.mxu1 %vm648_vm1, %v613_v60 }
  0xbb   : > { %3899 = vmatmul.msk.f32.gmra.mxu2 %vm648_vm1, %v615_v62 }
  0xc1   : > { %3816 = vmatmul.msk.f32.gmra.mxu0 %vm648_vm1, %v615_v62 }
  0xc2   : > { %3857 = vmatmul.msk.f32.gmra.mxu1 %vm648_vm1, %v614_v61 }
  0xc3   : > { %3900 = vmatmul.msk.f32.gmra.mxu2 %vm648_vm1, %v616_v63 }
  0xc9   : > { %3817 = vmatmul.msk.f32.gmra.mxu0 %vm648_vm1, %v616_v63 }
  0xca   : > { %3858 = vmatmul.msk.f32.gmra.mxu1 %vm648_vm1, %v615_v62 }
  0xcb   : > { %3901 = vmatmul.msk.f32.gmra.mxu2 %vm648_vm1, %v617_v0 }
  0xd1   : > { %3818 = vmatmul.msk.f32.gmra.mxu0 %vm648_vm1, %v617_v0 }
  0xd2   : > { %3859 = vmatmul.msk.f32.gmra.mxu1 %vm648_vm1, %v616_v63 }
  0xd3   : > { %3902 = vmatmul.msk.f32.gmra.mxu2 %vm648_vm1, %v618_v3 }
  0xd6   : > { %v790_v8 = vpop.f32.mrf.mxu0 }
  0xd7   : > { %v933_v11 = vpop.f32.mrf.mxu1 }
  0xd8   : > { %v934_v18 = vadd.f32 %v933_v11, %v790_v8 }
  0xd9   : > { %3819 = vmatmul.msk.f32.gmra.mxu0 %vm648_vm1, %v618_v3 }
  0xda   : > { %3860 = vmatmul.msk.f32.gmra.mxu1 %vm648_vm1, %v617_v0 }
  0xdb   : > { %3903 = vmatmul.msk.f32.gmra.mxu2 %vm648_vm1, %v619_v12 }
  0xde   : > { %v1079_v17 = vpop.f32.mrf.mxu2  ;;  %v793_v19 = vpop.f32.mrf.mxu0 }
  0xdf   : > { %v936_v22 = vpop.f32.mrf.mxu1  ;;  %v1199_v25 = vadd.f32 %v1079_v17, %v934_v18 }
  0xe0   : > { %v937_v27 = vadd.f32 %v936_v22, %v793_v19 }
  0xe1   : > { %3820 = vmatmul.msk.f32.gmra.mxu0 %vm648_vm1, %v619_v12  ;;  %v1243_v32 = vadd.f32 %v5521_v26, %v1199_v25 }
  0xe2   : > { %3861 = vmatmul.msk.f32.gmra.mxu1 %vm648_vm1, %v618_v3 }
  0xe3   : > { %3904 = vmatmul.msk.f32.gmra.mxu2 %vm648_vm1, %v620_v23  ;;  %v1283_v41 = vmax.f32 %v1243_v32, 0.0  ;;  %v627_v32 = vld [vmem:[%s5392_s16 + $0xd0] sm:$0xff] }
  0xe6   : > { %v1082_v31 = vpop.f32.mrf.mxu2  ;;  %v796_v34 = vpop.f32.mrf.mxu0 }
  0xe7   : > { %v1200_v33 = vadd.f32 %v1082_v31, %v937_v27  ;;  %v939_v37 = vpop.f32.mrf.mxu1 }
  0xe8   : > { %v940_v48 = vadd.f32 %v939_v37, %v796_v34 }
  0xe9   : > { %v1244_v40 = vadd.f32 %v5521_v26, %v1200_v33  ;;  %3821 = vmatmul.msk.f32.gmra.mxu0 %vm648_vm1, %v620_v23 }
  0xea   : > { %3862 = vmatmul.msk.f32.gmra.mxu1 %vm648_vm1, %v619_v12 }
  0xeb   : > { %v1284_v42 = vmax.f32 %v1244_v40, 0.0  ;;  %3905 = vmatmul.msk.f32.gmra.mxu2 %vm648_vm1, %v621_v38 }
  0xed   : > { %v1323_v46 = vmax.f32 %v1283_v41, %v1284_v42  ;;  %v628_v42 = vld [vmem:[%s5392_s16 + $0xd8] sm:$0xff] }
  0xee   : > { %v1085_v47 = vpop.f32.mrf.mxu2  ;;  %v799_v49 = vpop.f32.mrf.mxu0 }
  0xef   : > { %v942_v50 = vpop.f32.mrf.mxu1  ;;  %v1201_v52 = vadd.f32 %v1085_v47, %v940_v48 }
  0xf0   : > { %v943_v53 = vadd.f32 %v942_v50, %v799_v49  ;;  %v629_v50 = vld [vmem:[%s5392_s16 + $0xe0] sm:$0xff] }
  0xf1   : > { %3822 = vmatmul.msk.f32.gmra.mxu0 %vm648_vm1, %v621_v38  ;;  %v1245_v55 = vadd.f32 %v5521_v26, %v1201_v52 }
  0xf2   : > { %3863 = vmatmul.msk.f32.gmra.mxu1 %vm648_vm1, %v620_v23  ;;  %v626_v23 = vld [vmem:[%s5392_s16 + $0xc8] sm:$0xff] }
  0xf3   : > { %3906 = vmatmul.msk.f32.gmra.mxu2 %vm648_vm1, %v622_v51  ;;  %v1285_v61 = vmax.f32 %v1245_v55, 0.0 }
  0xf6   : > { %v1088_v54 = vpop.f32.mrf.mxu2  ;;  %v802_v57 = vpop.f32.mrf.mxu0 }
  0xf7   : > { %v1202_v56 = vadd.f32 %v1088_v54, %v943_v53  ;;  %v945_v58 = vpop.f32.mrf.mxu1 }
  0xf8   : > { %v946_v1 = vadd.f32 %v945_v58, %v802_v57 }
  0xf9   : > { %v1246_v60 = vadd.f32 %v5521_v26, %v1202_v56  ;;  %3823 = vmatmul.msk.f32.gmra.mxu0 %vm648_vm1, %v622_v51 }
  0xfa   : > { %3864 = vmatmul.msk.f32.gmra.mxu1 %vm648_vm1, %v621_v38 }
  0xfb   : > { %v1286_v62 = vmax.f32 %v1246_v60, 0.0  ;;  %3907 = vmatmul.msk.f32.gmra.mxu2 %vm648_vm1, %v623_v59  ;;  %v630_v60 = vld [vmem:[%s5392_s16 + $0xe8] sm:$0xff] }
  0xfd   : > { %v1324_v63 = vmax.f32 %v1285_v61, %v1286_v62 }
  0xfe   : > { %v1091_v0 = vpop.f32.mrf.mxu2  ;;  %v805_v2 = vpop.f32.mrf.mxu0 }
  0xff   : > { %v5559_v3 = vpack.c.bf16 %v1324_v63, %v1323_v46  ;;  %v948_v4 = vpop.f32.mrf.mxu1  ;;  %v1203_v6 = vadd.f32 %v1091_v0, %v946_v1 }
 0x100   : > { %v949_v7 = vadd.f32 %v948_v4, %v805_v2 }
 0x101   : > { %3824 = vmatmul.msk.f32.gmra.mxu0 %vm648_vm1, %v623_v59  ;;  %v1247_v9 = vadd.f32 %v5521_v26, %v1203_v6 }
 0x102   : > { %3865 = vmatmul.msk.f32.gmra.mxu1 %vm648_vm1, %v622_v51 }
 0x103   : > { %3908 = vmatmul.msk.f32.gmra.mxu2 %vm648_vm1, %v624_v5  ;;  %v1287_v15 = vmax.f32 %v1247_v9, 0.0 }
 0x106   : > { %v1094_v8 = vpop.f32.mrf.mxu2  ;;  %v808_v11 = vpop.f32.mrf.mxu0 }
 0x107   : > { %v1204_v10 = vadd.f32 %v1094_v8, %v949_v7  ;;  %v951_v12 = vpop.f32.mrf.mxu1 }
 0x108   : > { %v952_v19 = vadd.f32 %v951_v12, %v808_v11 }
 0x109   : > { %v1248_v14 = vadd.f32 %v5521_v26, %v1204_v10  ;;  %3825 = vmatmul.msk.f32.gmra.mxu0 %vm648_vm1, %v624_v5 }
 0x10a   : > { %3866 = vmatmul.msk.f32.gmra.mxu1 %vm648_vm1, %v623_v59 }
 0x10b   : > { %v1288_v16 = vmax.f32 %v1248_v14, 0.0  ;;  %3909 = vmatmul.msk.f32.gmra.mxu2 %vm648_vm1, %v625_v13 }
 0x10d   : > { %v1325_v17 = vmax.f32 %v1287_v15, %v1288_v16  ;;  %v632_v15 = vld [vmem:[%s5392_s16 + $0xf8] sm:$0xff] }
 0x10e   : > { %v1097_v18 = vpop.f32.mrf.mxu2  ;;  %v811_v20 = vpop.f32.mrf.mxu0 }
 0x10f   : > { %v5571_v21 = vpack.c.bf16 %v1325_v17, %v1324_v63  ;;  %v954_v22 = vpop.f32.mrf.mxu1  ;;  %v1205_v24 = vadd.f32 %v1097_v18, %v952_v19 }
 0x110   : > { %v955_v25 = vadd.f32 %v954_v22, %v811_v20 }
 0x111   : > { %1482 = vmatmul.bf16.vlgmr.msra.gmra.mxu3 %v5571_v21  ;;  %3826 = vmatmul.msk.f32.gmra.mxu0 %vm648_vm1, %v625_v13  ;;  %v1249_v28 = vadd.f32 %v5521_v26, %v1205_v24  ;;  %v633_v24 = vld [vmem:[%s5392_s16 + $0x100] sm:$0xff] }
 0x112   : > { %3867 = vmatmul.msk.f32.gmra.mxu1 %vm648_vm1, %v624_v5  ;;  %v631_v5 = vld [vmem:[%s5392_s16 + $0xf0] sm:$0xff] }
 0x113   : > { %3910 = vmatmul.msk.f32.gmra.mxu2 %vm648_vm1, %v626_v23  ;;  %v1289_v34 = vmax.f32 %v1249_v28, 0.0 }
 0x116   : > { %v1100_v27 = vpop.f32.mrf.mxu2  ;;  %v814_v30 = vpop.f32.mrf.mxu0 }
 0x117   : > { %v1206_v29 = vadd.f32 %v1100_v27, %v955_v25  ;;  %v957_v31 = vpop.f32.mrf.mxu1 }
 0x118   : > { %v958_v38 = vadd.f32 %v957_v31, %v814_v30 }
 0x119   : > { %v1250_v33 = vadd.f32 %v5521_v26, %v1206_v29  ;;  %3827 = vmatmul.msk.f32.gmra.mxu0 %vm648_vm1, %v626_v23 }
 0x11a   : > { %3868 = vmatmul.msk.f32.gmra.mxu1 %vm648_vm1, %v625_v13 }
 0x11b   : > { %v1290_v35 = vmax.f32 %v1250_v33, 0.0  ;;  %3911 = vmatmul.msk.f32.gmra.mxu2 %vm648_vm1, %v627_v32 }
 0x11d   : > { %v1326_v36 = vmax.f32 %v1289_v34, %v1290_v35  ;;  %v634_v35 = vld [vmem:[%s5392_s16 + $0x108] sm:$0xff] }
 0x11e   : > { %v1103_v37 = vpop.f32.mrf.mxu2  ;;  %v817_v39 = vpop.f32.mrf.mxu0 }
 0x11f   : > { %v5584_v40 = vpack.c.bf16 %v1326_v36, %v1325_v17  ;;  %v960_v41 = vpop.f32.mrf.mxu1  ;;  %v1207_v43 = vadd.f32 %v1103_v37, %v958_v38 }
 0x120   : > { %v961_v44 = vadd.f32 %v960_v41, %v817_v39 }
 0x121   : > { %3828 = vmatmul.msk.f32.gmra.mxu0 %vm648_vm1, %v627_v32  ;;  %v1251_v46 = vadd.f32 %v5521_v26, %v1207_v43 }
 0x122   : > { %3869 = vmatmul.msk.f32.gmra.mxu1 %vm648_vm1, %v626_v23 }
 0x123   : > { %3912 = vmatmul.msk.f32.gmra.mxu2 %vm648_vm1, %v628_v42  ;;  %v1291_v52 = vmax.f32 %v1251_v46, 0.0  ;;  %v4145_v46 = vld [vmem:[%s6271_s3 + $0x170] sm:$0xf] }
 0x126   : > { %v1106_v45 = vpop.f32.mrf.mxu2  ;;  %v820_v48 = vpop.f32.mrf.mxu0 }
 0x127   : > { %v1208_v47 = vadd.f32 %v1106_v45, %v961_v44  ;;  %v963_v49 = vpop.f32.mrf.mxu1  ;;  %v5630_v44 = vld [vmem:[%s5392_s16 + $0x110] sm:$0xff] }
 0x128   : > { %v964_v56 = vadd.f32 %v963_v49, %v820_v48  ;;  %v4841_v48 = vld [vmem:[%s6271_s3 + $0x174] sm:$0xf] }
 0x129   : > { %v1252_v51 = vadd.f32 %v5521_v26, %v1208_v47  ;;  %3829 = vmatmul.msk.f32.gmra.mxu0 %vm648_vm1, %v628_v42  ;;  %v4842_v47 = vld [vmem:[%s6271_s3 + $0x174] sm:$0xf0] }
 0x12a   : > { %3870 = vmatmul.msk.f32.gmra.mxu1 %vm648_vm1, %v627_v32  ;;  %v4146_v49 = vor.u32 %v4842_v47, %v4145_v46  ;;  %v4113_v46 = vld [vmem:[%s6271_s3 + $0x130] sm:$0xf]  ;;  %v4834_v47 = vld [vmem:[%s6271_s3 + $0x134] sm:$0xf0] }
 0x12b   : > { %v1292_v53 = vmax.f32 %v1252_v51, 0.0  ;;  %3913 = vmatmul.msk.f32.gmra.mxu2 %vm648_vm1, %v629_v50  ;;  %v4809_v51 = vld [vmem:[%s6271_s3 + $0x74] sm:$0xf] }
 0x12c   : > { %1868 = vmatpush.bf16.msrb.mxu1 %v4146_v49 }
 0x12d   : > { %v1327_v54 = vmax.f32 %v1291_v52, %v1292_v53 }
 0x12e   : > { %v1109_v55 = vpop.f32.mrf.mxu2  ;;  %v823_v57 = vpop.f32.mrf.mxu0 }
 0x12f   : > { %v5596_v58 = vpack.c.bf16 %v1327_v54, %v1326_v36  ;;  %v966_v59 = vpop.f32.mrf.mxu1  ;;  %v1209_v61 = vadd.f32 %v1109_v55, %v964_v56  ;;  %v4067_v55 = vld [vmem:[%s6271_s3 + $0x78] sm:$0xf0] }
 0x130   : > { %v967_v62 = vadd.f32 %v966_v59, %v823_v57  ;;  %v4070_v56 = vor.u32 %v4809_v51, %v4067_v55  ;;  %v4807_v59 = vld [vmem:[%s6271_s3 + $0x64] sm:$0xf]  ;;  %v4114_v51 = vor.u32 %v4834_v47, %v4113_v46 }
 0x131   : > { %1487 = vmatmul.bf16.gmra.mxu3 %v5596_v58  ;;  %3830 = vmatmul.msk.f32.gmra.mxu0 %vm648_vm1, %v629_v50  ;;  %v1253_v0 = vadd.f32 %v5521_v26, %v1209_v61  ;;  %v4137_v61 = vld [vmem:[%s6271_s3 + $0x160] sm:$0xf] }
 0x132   : > { %3871 = vmatmul.msk.f32.gmra.mxu1 %vm648_vm1, %v628_v42  ;;  %1716 = vmatpush.bf16.msrb.mxu0 %v4070_v56  ;;  %v4799_v56 = vld [vmem:[%s6271_s3 + $0x24] sm:$0xf] }
 0x133   : > { %3914 = vmatmul.msk.f32.gmra.mxu2 %vm648_vm1, %v630_v60  ;;  %v1293_v7 = vmax.f32 %v1253_v0, 0.0  ;;  %v4839_v0 = vld [vmem:[%s6271_s3 + $0x164] sm:$0xf] }
 0x136   : > { %v1112_v63 = vpop.f32.mrf.mxu2  ;;  %v826_v2 = vpop.f32.mrf.mxu0 }
 0x137   : > { %v1210_v1 = vadd.f32 %v1112_v63, %v967_v62  ;;  %v969_v4 = vpop.f32.mrf.mxu1  ;;  %v4840_v63 = vld [vmem:[%s6271_s3 + $0x164] sm:$0xf0] }
 0x138   : > { %v970_v11 = vadd.f32 %v969_v4, %v826_v2 }
 0x139   : > { %v1254_v6 = vadd.f32 %v5521_v26, %v1210_v1  ;;  %3831 = vmatmul.msk.f32.gmra.mxu0 %vm648_vm1, %v630_v60  ;;  %v4139_v1 = vld [vmem:[%s6271_s3 + $0x168] sm:$0xf0] }
 0x13a   : > { %3872 = vmatmul.msk.f32.gmra.mxu1 %vm648_vm1, %v629_v50  ;;  %v4147_v50 = vld [vmem:[%s6271_s3 + $0x178] sm:$0xf0] }
 0x13b   : > { %v1294_v8 = vmax.f32 %v1254_v6, 0.0  ;;  %3915 = vmatmul.msk.f32.gmra.mxu2 %vm648_vm1, %v631_v5  ;;  %v4138_v6 = vor.u32 %v4840_v63, %v4137_v61  ;;  %v4832_v61 = vld [vmem:[%s6271_s3 + $0x124] sm:$0xf0]  ;;  %v4107_v63 = vld [vmem:[%s6271_s3 + $0x128] sm:$0xf0] }
 0x13d   : > { %v1328_v9 = vmax.f32 %v1293_v7, %v1294_v8  ;;  %v4142_v7 = vor.u32 %v4839_v0, %v4139_v1  ;;  %1869 = vmatpush.bf16.msrb.mxu1 %v4138_v6 }
 0x13e   : > { %v1115_v10 = vpop.f32.mrf.mxu2  ;;  %v829_v12 = vpop.f32.mrf.mxu0 }
 0x13f   : > { %v5609_v13 = vpack.c.bf16 %v1328_v9, %v1327_v54  ;;  %v972_v14 = vpop.f32.mrf.mxu1  ;;  %v1211_v16 = vadd.f32 %v1115_v10, %v970_v11  ;;  %v4150_v54 = vor.u32 %v4841_v48, %v4147_v50  ;;  %v4805_v11 = vld [vmem:[%s6271_s3 + $0x54] sm:$0xf] }
 0x140   : > { %v973_v17 = vadd.f32 %v972_v14, %v829_v12  ;;  %v4051_v12 = vld [vmem:[%s6271_s3 + $0x58] sm:$0xf0]  ;;  %v4129_v14 = vld [vmem:[%s6271_s3 + $0x150] sm:$0xf]  ;;  %v4833_v48 = vld [vmem:[%s6271_s3 + $0x134] sm:$0xf] }
 0x141   : > { %3832 = vmatmul.msk.f32.gmra.mxu0 %vm648_vm1, %v631_v5  ;;  %v1255_v19 = vadd.f32 %v5521_v26, %v1211_v16  ;;  %1922 = vmatpush.bf16.msrb.mxu2 %v4150_v54  ;;  %v4837_v16 = vld [vmem:[%s6271_s3 + $0x154] sm:$0xf] }
 0x142   : > { %3873 = vmatmul.msk.f32.gmra.mxu1 %vm648_vm1, %v630_v60  ;;  %v4059_v60 = vld [vmem:[%s6271_s3 + $0x68] sm:$0xf0] }
 0x143   : > { %3916 = vmatmul.msk.f32.gmra.mxu2 %vm648_vm1, %v632_v15  ;;  %v1295_v27 = vmax.f32 %v1255_v19, 0.0  ;;  %v4062_v10 = vor.u32 %v4807_v59, %v4059_v60  ;;  %v4105_v59 = vld [vmem:[%s6271_s3 + $0x120] sm:$0xf] }
 0x145   : > { %1923 = vmatpush.bf16.msrb.mxu2 %v4142_v7  ;;  %1717 = vmatpush.bf16.msrb.mxu0 %v4062_v10  ;;  %v638_v7 = vld [vmem:[%s5392_s16 + $0x128] sm:$0xff]  ;;  %v4797_v10 = vld [vmem:[%s6271_s3 + $0x14] sm:$0xf] }
 0x146   : > { %v1118_v18 = vpop.f32.mrf.mxu2  ;;  %v832_v22 = vpop.f32.mrf.mxu0 }
 0x147   : > { %v1212_v20 = vadd.f32 %v1118_v18, %v973_v17  ;;  %v975_v23 = vpop.f32.mrf.mxu1 }
 0x148   : > { %v976_v31 = vadd.f32 %v975_v23, %v832_v22  ;;  %v4054_v22 = vor.u32 %v4805_v11, %v4051_v12  ;;  %v4019_v11 = vld [vmem:[%s6271_s3 + $0x18] sm:$0xf0]  ;;  %v4830_v12 = vld [vmem:[%s6271_s3 + $0x114] sm:$0xf0] }
 0x149   : > { %v1256_v25 = vadd.f32 %v5521_v26, %v1212_v20  ;;  %3833 = vmatmul.msk.f32.gmra.mxu0 %vm648_vm1, %v632_v15  ;;  %v4131_v20 = vld [vmem:[%s6271_s3 + $0x158] sm:$0xf0] }
 0x14a   : > { %3874 = vmatmul.msk.f32.gmra.mxu1 %vm648_vm1, %v631_v5  ;;  %v4134_v23 = vor.u32 %v4837_v16, %v4131_v20  ;;  %1718 = vmatpush.bf16.msrb.mxu0 %v4054_v22  ;;  %v4003_v16 = vld [vmem:[%s6271_s3 + $0xf8] sm:$0xf0]  ;;  %v4795_v22 = vld [vmem:[%s6271_s3 + $0x4] sm:$0xf] }
 0x14b   : > { %v1296_v28 = vmax.f32 %v1256_v25, 0.0  ;;  %3917 = vmatmul.msk.f32.gmra.mxu2 %vm648_vm1, %v633_v24  ;;  %v4043_v25 = vld [vmem:[%s6271_s3 + $0x48] sm:$0xf0]  ;;  %v4099_v20 = vld [vmem:[%s6271_s3 + $0x118] sm:$0xf0] }
 0x14c   : > { %1924 = vmatpush.bf16.msrb.mxu2 %v4134_v23  ;;  %v4011_v23 = vld [vmem:[%s6271_s3 + $0x8] sm:$0xf0] }
 0x14d   : > { %v1329_v29 = vmax.f32 %v1295_v27, %v1296_v28  ;;  %v4121_v27 = vld [vmem:[%s6271_s3 + $0x140] sm:$0xf] }
 0x14e   : > { %v1121_v30 = vpop.f32.mrf.mxu2  ;;  %v835_v32 = vpop.f32.mrf.mxu0 }
 0x14f   : > { %v5621_v33 = vpack.c.bf16 %v1329_v29, %v1328_v9  ;;  %v978_v34 = vpop.f32.mrf.mxu1  ;;  %v1213_v36 = vadd.f32 %v1121_v30, %v976_v31  ;;  %v5679_v9 = vld [vmem:[%s5392_s16 + $0x118] sm:$0xff]  ;;  %v4835_v30 = vld [vmem:[%s6271_s3 + $0x144] sm:$0xf] }
 0x150   : > { %v979_v37 = vadd.f32 %v978_v34, %v835_v32  ;;  %v4123_v31 = vld [vmem:[%s6271_s3 + $0x148] sm:$0xf0] }
 0x151   : > { %1492 = vmatmul.bf16.gmra.mxu3 %v5621_v33  ;;  %3834 = vmatmul.msk.f32.gmra.mxu0 %vm648_vm1, %v633_v24  ;;  %v1257_v39 = vadd.f32 %v5521_v26, %v1213_v36 }
 0x152   : > { %3875 = vmatmul.msk.f32.gmra.mxu1 %vm648_vm1, %v632_v15  ;;  %v4838_v15 = vld [vmem:[%s6271_s3 + $0x154] sm:$0xf0] }
 0x153   : > { %3918 = vmatmul.msk.f32.gmra.mxu2 %vm648_vm1, %v634_v35  ;;  %v1297_v52 = vmax.f32 %v1257_v39, 0.0  ;;  %v4130_v19 = vor.u32 %v4838_v15, %v4129_v14  ;;  %v5728_v39 = vld [vmem:[%s5392_s16 + $0x120] sm:$0xff] }
 0x154   : > { %v4829_v14 = vld [vmem:[%s6271_s3 + $0x114] sm:$0xf] }
 0x155   : > { %1870 = vmatpush.bf16.msrb.mxu1 %v4130_v19  ;;  %v4825_v15 = vld [vmem:[%s6271_s3 + $0xf4] sm:$0xf]  ;;  %v4022_v19 = vor.u32 %v4797_v10, %v4019_v11 }
 0x156   : > { %v1124_v38 = vpop.f32.mrf.mxu2  ;;  %v838_v42 = vpop.f32.mrf.mxu0 }
 0x157   : > { %v1214_v41 = vadd.f32 %v1124_v38, %v979_v37  ;;  %v981_v43 = vpop.f32.mrf.mxu1  ;;  %v4126_v37 = vor.u32 %v4835_v30, %v4123_v31 }
 0x158   : > { %v982_v2 = vadd.f32 %v981_v43, %v838_v42  ;;  %v4801_v43 = vld [vmem:[%s6271_s3 + $0x34] sm:$0xf] }
 0x159   : > { %v1258_v45 = vadd.f32 %v5521_v26, %v1214_v41  ;;  %3835 = vmatmul.msk.f32.gmra.mxu0 %vm648_vm1, %v634_v35  ;;  %1925 = vmatpush.bf16.msrb.mxu2 %v4126_v37 }
 0x15a   : > { %3876 = vmatmul.msk.f32.gmra.mxu1 %vm648_vm1, %v633_v24  ;;  %v4803_v24 = vld [vmem:[%s6271_s3 + $0x44] sm:$0xf] }
 0x15b   : > { %v1298_v53 = vmax.f32 %v1258_v45, 0.0  ;;  %3919 = vmatmul.msk.f32.gmra.mxu2 %vm648_vm1, %v5630_v44  ;;  %v4046_v41 = vor.u32 %v4803_v24, %v4043_v25  ;;  %v4035_v45 = vld [vmem:[%s6271_s3 + $0x38] sm:$0xf0]  ;;  %v4089_v24 = vld [vmem:[%s6271_s3 + $0x100] sm:$0xf] }
 0x15d   : > { %v5655_v57 = vmax.f32 %v1297_v52, %v1298_v53  ;;  %v4115_v52 = vld [vmem:[%s6271_s3 + $0x138] sm:$0xf0]  ;;  %1719 = vmatpush.bf16.msrb.mxu0 %v4046_v41  ;;  %v4038_v53 = vor.u32 %v4801_v43, %v4035_v45 }
 0x15e   : > { %v1127_v62 = vpop.f32.mrf.mxu2  ;;  %v841_v4 = vpop.f32.mrf.mxu0  ;;  %v4118_v54 = vor.u32 %v4833_v48, %v4115_v52  ;;  %v640_v48 = vld [vmem:[%s5392_s16 + $0x138] sm:$0xff] }
 0x15f   : > { %v5676_v5 = vpack.c.bf16 %v5655_v57, %v1329_v29  ;;  %v984_v8 = vpop.f32.mrf.mxu1  ;;  %v1215_v17 = vadd.f32 %v1127_v62, %v982_v2  ;;  %v4836_v29 = vld [vmem:[%s6271_s3 + $0x144] sm:$0xf0]  ;;  %v4831_v62 = vld [vmem:[%s6271_s3 + $0x124] sm:$0xf]  ;;  %v4106_v2 = vor.u32 %v4832_v61, %v4105_v59 }
 0x160   : > { %v985_v18 = vadd.f32 %v984_v8, %v841_v4  ;;  %v4122_v36 = vor.u32 %v4836_v29, %v4121_v27  ;;  %1926 = vmatpush.bf16.msrb.mxu2 %v4118_v54  ;;  %v4110_v4 = vor.u32 %v4831_v62, %v4107_v63  ;;  %v4828_v27 = vld [vmem:[%s6271_s3 + $0x104] sm:$0xf0]  ;;  %v4091_v29 = vld [vmem:[%s6271_s3 + $0x108] sm:$0xf0]  ;;  %v641_v62 = vld [vmem:[%s5392_s16 + $0x140] sm:$0xff] }
 0x161   : > { %3836 = vmatmul.msk.f32.gmra.mxu0 %vm648_vm1, %v5630_v44  ;;  %v1259_v32 = vadd.f32 %v5521_v26, %v1215_v17  ;;  %v4090_v31 = vor.u32 %v4828_v27, %v4089_v24 }
 0x162   : > { %3877 = vmatmul.msk.f32.gmra.mxu1 %vm648_vm1, %v634_v35  ;;  %1720 = vmatpush.bf16.msrb.mxu0 %v4038_v53 }
 0x163   : > { %3920 = vmatmul.msk.f32.gmra.mxu2 %vm648_vm1, %v5679_v9  ;;  %1871 = vmatpush.bf16.msrb.mxu1 %v4122_v36  ;;  %v1299_v49 = vmax.f32 %v1259_v32, 0.0  ;;  %v4014_v36 = vor.u32 %v4795_v22, %v4011_v23 }
 0x164   : > { %1927 = vmatpush.bf16.msrb.mxu2 %v4110_v4 }
 0x166   : > { %v1130_v28 = vpop.f32.mrf.mxu2  ;;  %v5723_v35 = vpop.f32.mrf.mxu0 }
 0x167   : > { %v1216_v34 = vadd.f32 %v1130_v28, %v985_v18  ;;  %v5725_v38 = vpop.f32.mrf.mxu1  ;;  %1872 = vmatpush.bf16.msrb.mxu1 %v4114_v51  ;;  %v4006_v18 = vor.u32 %v4825_v15, %v4003_v16  ;;  %v4827_v28 = vld [vmem:[%s6271_s3 + $0x104] sm:$0xf]  ;;  %v4821_v15 = vld [vmem:[%s6271_s3 + $0xd4] sm:$0xf]  ;;  %v3987_v16 = vld [vmem:[%s6271_s3 + $0xd8] sm:$0xf0] }
 0x168   : > { %v4094_v37 = vor.u32 %v4827_v28, %v4091_v29  ;;  %v988_v43 = vadd.f32 %v5725_v38, %v5723_v35  ;;  %v4823_v35 = vld [vmem:[%s6271_s3 + $0xe4] sm:$0xf]  ;;  %v3995_v38 = vld [vmem:[%s6271_s3 + $0xe8] sm:$0xf0] }
 0x169   : > { %v1260_v42 = vadd.f32 %v5521_v26, %v1216_v34  ;;  %3837 = vmatmul.msk.f32.gmra.mxu0 %vm648_vm1, %v5679_v9  ;;  %1528 = vmatpush.bf16.msrb.mxu3 %v4006_v18  ;;  %v639_v34 = vld [vmem:[%s5392_s16 + $0x130] sm:$0xff]  ;;  %v3998_v52 = vor.u32 %v4823_v35, %v3995_v38 }
 0x16a   : > { %3878 = vmatmul.msk.f32.gmra.mxu1 %vm648_vm1, %v5630_v44  ;;  %v4027_v44 = vld [vmem:[%s6271_s3 + $0x28] sm:$0xf0] }
 0x16b   : > { %v1300_v50 = vmax.f32 %v1260_v42, 0.0  ;;  %3921 = vmatmul.msk.f32.gmra.mxu2 %vm648_vm1, %v5728_v39  ;;  %v4030_v8 = vor.u32 %v4799_v56, %v4027_v44  ;;  %1873 = vmatpush.bf16.msrb.mxu1 %v4106_v2 }
 0x16d   : > { %v5755_v55 = vmax.f32 %v1299_v49, %v1300_v50  ;;  %1721 = vmatpush.bf16.msrb.mxu0 %v4030_v8  ;;  %1529 = vmatpush.bf16.msrb.mxu3 %v3998_v52 }
 0x16e   : > { %v5766_v60 = vpop.f32.mrf.mxu2  ;;  %v847_v0 = vpop.f32.mrf.mxu0 }
 0x16f   : > { %v5779_v1 = vpack.c.bf16 %v5755_v55, %v5655_v57  ;;  %v990_v6 = vpop.f32.mrf.mxu1  ;;  %v4097_v57 = vld [vmem:[%s6271_s3 + $0x110] sm:$0xf]  ;;  %v1217_v50 = vadd.f32 %v5766_v60, %v988_v43 }
 0x170   : > { %v4098_v17 = vor.u32 %v4830_v12, %v4097_v57  ;;  %v991_v41 = vadd.f32 %v990_v6, %v847_v0 }
 0x171   : > { %1497 = vmatmul.bf16.gmra.mxu3 %v5779_v1  ;;  %3838 = vmatmul.msk.f32.gmra.mxu0 %vm648_vm1, %v5728_v39  ;;  %v1261_v56 = vadd.f32 %v5521_v26, %v1217_v50  ;;  %v4819_v50 = vld [vmem:[%s6271_s3 + $0xc4] sm:$0xf] }
 0x172   : > { %3879 = vmatmul.msk.f32.gmra.mxu1 %vm648_vm1, %v5679_v9  ;;  %v4102_v9 = vor.u32 %v4829_v14, %v4099_v20  ;;  %1722 = vmatpush.bf16.msrb.mxu0 %v4022_v19  ;;  %v642_v14 = vld [vmem:[%s5392_s16 + $0x148] sm:$0xff]  ;;  %s600_s16 = scalar_lea.vmem [#allocation6], %s3799_s27 }
 0x173   : > { %3922 = vmatmul.msk.f32.gmra.mxu2 %vm648_vm1, %v638_v7  ;;  %1874 = vmatpush.bf16.msrb.mxu1 %v4098_v17  ;;  %v1301_v2 = vmax.f32 %v1261_v56, 0.0  ;;  %v3990_v17 = vor.u32 %v4821_v15, %v3987_v16  ;;  %s3712_s25 = sshll.u32 %s600_s16, 4  ;;  %s3713_s25 = int_to_ptr.vmem [resolvable:$true] %s3712_s25 }
 0x174   : > { %1928 = vmatpush.bf16.msrb.mxu2 %v4102_v9 }
 0x175   : > { %1530 = vmatpush.bf16.msrb.mxu3 %v3990_v17 }
 0x176   : > { %v1136_v25 = vpop.f32.mrf.mxu2  ;;  %v850_v30 = vpop.f32.mrf.mxu0  ;;  %1723 = vmatpush.bf16.msrb.mxu0 %v4014_v36 }
 0x177   : > { %v993_v32 = vpop.f32.mrf.mxu1  ;;  %1875 = vmatpush.bf16.msrb.mxu1 %v4090_v31  ;;  %v1218_v49 = vadd.f32 %v1136_v25, %v991_v41 }
 0x178   : > { %1929 = vmatpush.bf16.msrb.mxu2 %v4094_v37  ;;  %v994_v45 = vadd.f32 %v993_v32, %v850_v30 }
 0x179   : > { %3839 = vmatmul.msk.f32.gmra.mxu0 %vm648_vm1, %v638_v7  ;;  %v1262_v53 = vadd.f32 %v5521_v26, %v1218_v49 }
 0x17a   : > { %3880 = vmatmul.msk.f32.gmra.mxu1 %vm648_vm1, %v5728_v39 }
 0x17b   : > { %3923 = vmatmul.msk.f32.gmra.mxu2 %vm648_vm1, %v639_v34  ;;  %v1302_v63 = vmax.f32 %v1262_v53, 0.0 }
 0x17e   : > { %v1139_v42 = vpop.f32.mrf.mxu2  ;;  %v853_v46 = vpop.f32.mrf.mxu0 }
 0x17f   : > { %v996_v47 = vpop.f32.mrf.mxu1  ;;  %v1219_v39 = vadd.f32 %v1139_v42, %v994_v45 }
 0x180   : > { %v997_v51 = vadd.f32 %v996_v47, %v853_v46 }
 0x181   : > { %3840 = vmatmul.msk.f32.gmra.mxu0 %vm648_vm1, %v639_v34  ;;  %v1263_v44 = vadd.f32 %v5521_v26, %v1219_v39  ;;  %v3979_v39 = vld [vmem:[%s6271_s3 + $0xc8] sm:$0xf0] }
 0x182   : > { %3881 = vmatmul.msk.f32.gmra.mxu1 %vm648_vm1, %v638_v7  ;;  %v5856_v7 = vmax.f32 %v1301_v2, %v1302_v63 }
 0x183   : > { %3924 = vmatmul.msk.f32.gmra.mxu2 %vm648_vm1, %v640_v48  ;;  %v1303_v4 = vmax.f32 %v1263_v44, 0.0 }
 0x186   : > { %v1142_v54 = vpop.f32.mrf.mxu2  ;;  %v856_v60 = vpop.f32.mrf.mxu0 }
 0x187   : > { %v1220_v59 = vadd.f32 %v1142_v54, %v997_v51  ;;  %v999_v61 = vpop.f32.mrf.mxu1  ;;  %v3982_v51 = vor.u32 %v4819_v50, %v3979_v39  ;;  %v3955_v50 = vld [vmem:[%s6271_s3 + $0x98] sm:$0xf0] }
 0x188   : > { %v1000_v22 = vadd.f32 %v999_v61, %v856_v60  ;;  %v4817_v61 = vld [vmem:[%s6271_s3 + $0xb4] sm:$0xf] }
 0x189   : > { %v1264_v0 = vadd.f32 %v5521_v26, %v1220_v59  ;;  %3841 = vmatmul.msk.f32.gmra.mxu0 %vm648_vm1, %v640_v48  ;;  %1531 = vmatpush.bf16.msrb.mxu3 %v3982_v51 }
 0x18a   : > { %3882 = vmatmul.msk.f32.gmra.mxu1 %vm648_vm1, %v639_v34 }
 0x18b   : > { %v1304_v6 = vmax.f32 %v1264_v0, 0.0  ;;  %3925 = vmatmul.msk.f32.gmra.mxu2 %vm648_vm1, %v641_v62 }
 0x18d   : > { %v5858_v8 = vmax.f32 %v1303_v4, %v1304_v6 }
 0x18e   : > { %v1145_v10 = vpop.f32.mrf.mxu2  ;;  %v859_v11 = vpop.f32.mrf.mxu0 }
 0x18f   : > { %v5862_v57 = vpack.c.bf16 %v5858_v8, %v5856_v7  ;;  %v1002_v12 = vpop.f32.mrf.mxu1  ;;  %v1221_v29 = vadd.f32 %v1145_v10, %v1000_v22 }
 0x190   : > { %v1003_v9 = vadd.f32 %v1002_v12, %v859_v11 }
 0x191   : > { %1502 = vmatmul.bf16.gmra.mxu3 %v5862_v57  ;;  %3842 = vmatmul.msk.f32.gmra.mxu0 %vm648_vm1, %v641_v62  ;;  %v1265_v34 = vadd.f32 %v5521_v26, %v1221_v29  ;;  %v3971_v62 = vld [vmem:[%s6271_s3 + $0xb8] sm:$0xf0] }
 0x192   : > { %3883 = vmatmul.msk.f32.gmra.mxu1 %vm648_vm1, %v640_v48  ;;  %v3974_v63 = vor.u32 %v4817_v61, %v3971_v62 }
 0x193   : > { %3926 = vmatmul.msk.f32.gmra.mxu2 %vm648_vm1, %v642_v14  ;;  %v1305_v47 = vmax.f32 %v1265_v34, 0.0 }
 0x194   : > { %1532 = vmatpush.bf16.msrb.mxu3 %v3974_v63 }
 0x196   : > { %v1148_v18 = vpop.f32.mrf.mxu2  ;;  %v862_v19 = vpop.f32.mrf.mxu0 }
 0x197   : > { %v1005_v20 = vpop.f32.mrf.mxu1  ;;  %v1222_v28 = vadd.f32 %v1148_v18, %v1003_v9 }
 0x198   : > { %v1006_v24 = vadd.f32 %v1005_v20, %v862_v19 }
 0x199   : > { %1724 = vmatmul.bf16.vlgmr.msrb.gmra.mxu0 %v5559_v3  ;;  %v1266_v32 = vadd.f32 %v5521_v26, %v1222_v28 }
 0x19a   : > { %1876 = vmatmul.bf16.vlgmr.msrb.gmra.mxu1 %v5584_v40 }
 0x19b   : > { %1930 = vmatmul.bf16.vlgmr.msrb.gmra.mxu2 %v5584_v40  ;;  %v1306_v45 = vmax.f32 %v1266_v32, 0.0 }
 0x19d   : > { %v1334_v35 = vmax.f32 %v1305_v47, %v1306_v45 }
 0x19e   : > { %v1151_v23 = vpop.f32.mrf.mxu2  ;;  %v865_v25 = vpop.f32.mrf.mxu0 }
 0x19f   : > { %v1008_v27 = vpop.f32.mrf.mxu1  ;;  %v1223_v30 = vadd.f32 %v1151_v23, %v1006_v24  ;;  %v5911_v24 = vpack.c.bf16 %v5856_v7, %v5755_v55  ;;  %v3963_v55 = vld [vmem:[%s6271_s3 + $0xa8] sm:$0xf0]  ;;  %v5927_v47 = vpack.c.bf16 %v1334_v35, %v5858_v8 }
 0x1a0   : > { %v1009_v31 = vadd.f32 %v1008_v27, %v865_v25 }
 0x1a1   : > { %v1267_v37 = vadd.f32 %v5521_v26, %v1223_v30 }
 0x1a3   : > { %v1307_v48 = vmax.f32 %v1267_v37, 0.0 }
 0x1a6   : > { %v1154_v36 = vpop.f32.mrf.mxu2  ;;  %v868_v42 = vpop.f32.mrf.mxu0 }
 0x1a7   : > { %v1224_v41 = vadd.f32 %v1154_v36, %v1009_v31  ;;  %v1011_v43 = vpop.f32.mrf.mxu1  ;;  %v4815_v31 = vld [vmem:[%s6271_s3 + $0xa4] sm:$0xf] }
 0x1a8   : > { %v1012_v2 = vadd.f32 %v1011_v43, %v868_v42  ;;  %v3966_v7 = vor.u32 %v4815_v31, %v3963_v55 }
 0x1a9   : > { %v1268_v46 = vadd.f32 %v5521_v26, %v1224_v41  ;;  %1729 = vmatmul.bf16.gmra.mxu0 %v5584_v40 }
 0x1aa   : > { %1881 = vmatmul.bf16.gmra.mxu1 %v5609_v13  ;;  %1533 = vmatpush.bf16.msrb.mxu3 %v3966_v7 }
 0x1ab   : > { %v1308_v49 = vmax.f32 %v1268_v46, 0.0  ;;  %1935 = vmatmul.bf16.gmra.mxu2 %v5609_v13 }
 0x1ad   : > { %v5891_v38 = vmax.f32 %v1307_v48, %v1308_v49  ;;  %v4813_v49 = vld [vmem:[%s6271_s3 + $0x94] sm:$0xf] }
 0x1ae   : > { %v1157_v52 = vpop.f32.mrf.mxu2  ;;  %v871_v53 = vpop.f32.mrf.mxu0  ;;  %v3958_v51 = vor.u32 %v4813_v49, %v3955_v50  ;;  %v4810_v49 = vld [vmem:[%s6271_s3 + $0x74] sm:$0xf0] }
 0x1af   : > { %v5894_v54 = vpack.c.bf16 %v5891_v38, %v1334_v35  ;;  %v1014_v56 = vpop.f32.mrf.mxu1  ;;  %v1225_v14 = vadd.f32 %v1157_v52, %v1012_v2 }
 0x1b0   : > { %v1015_v0 = vadd.f32 %v1014_v56, %v871_v53  ;;  %1534 = vmatpush.bf16.msrb.mxu3 %v3958_v51 }
 0x1b1   : > { %1507 = vmatmul.bf16.gmra.mxu3 %v5894_v54  ;;  %v1269_v18 = vadd.f32 %v5521_v26, %v1225_v14 }
 0x1b3   : > { %v1309_v28 = vmax.f32 %v1269_v18, 0.0 }
 0x1b6   : > { %v1160_v44 = vpop.f32.mrf.mxu2  ;;  %v874_v59 = vpop.f32.mrf.mxu0 }
 0x1b7   : > { %v1017_v60 = vpop.f32.mrf.mxu1  ;;  %v1226_v12 = vadd.f32 %v1160_v44, %v1015_v0 }
 0x1b8   : > { %v1018_v6 = vadd.f32 %v1017_v60, %v874_v59 }
 0x1b9   : > { %1734 = vmatmul.bf16.gmra.mxu0 %v5609_v13  ;;  %v1270_v17 = vadd.f32 %v5521_v26, %v1226_v12 }
 0x1ba   : > { %1886 = vmatmul.bf16.gmra.mxu1 %v5676_v5 }
 0x1bb   : > { %1940 = vmatmul.bf16.gmra.mxu2 %v5676_v5  ;;  %v1310_v25 = vmax.f32 %v1270_v17, 0.0 }
 0x1bd   : > { %v1336_v32 = vmax.f32 %v1309_v28, %v1310_v25 }
 0x1be   : > { %v1163_v4 = vpop.f32.mrf.mxu2  ;;  %v877_v10 = vpop.f32.mrf.mxu0 }
 0x1bf   : > { %v1020_v11 = vpop.f32.mrf.mxu1  ;;  %v1227_v15 = vadd.f32 %v1163_v4, %v1018_v6 }
 0x1c0   : > { %v1021_v16 = vadd.f32 %v1020_v11, %v877_v10  ;;  %v5942_v10 = vpack.c.bf16 %v1336_v32, %v5891_v38 }
 0x1c1   : > { %v1271_v20 = vadd.f32 %v5521_v26, %v1227_v15 }
 0x1c3   : > { %v1311_v29 = vmax.f32 %v1271_v20, 0.0 }
 0x1c6   : > { %v1166_v19 = vpop.f32.mrf.mxu2  ;;  %v880_v22 = vpop.f32.mrf.mxu0 }
 0x1c7   : > { %v1228_v9 = vadd.f32 %v1166_v19, %v1021_v16  ;;  %v1023_v23 = vpop.f32.mrf.mxu1 }
 0x1c8   : > { %v1024_v52 = vadd.f32 %v1023_v23, %v880_v22  ;;  %v3947_v22 = vld [vmem:[%s6271_s3 + $0x88] sm:$0xf0] }
 0x1c9   : > { %v1272_v27 = vadd.f32 %v5521_v26, %v1228_v9  ;;  %1739 = vmatmul.bf16.gmra.mxu0 %v5676_v5 }
 0x1ca   : > { %1891 = vmatmul.bf16.gmra.mxu1 %v5911_v24 }
 0x1cb   : > { %v1312_v30 = vmax.f32 %v1272_v27, 0.0  ;;  %1945 = vmatmul.bf16.gmra.mxu2 %v5911_v24 }
 0x1cd   : > { %v1337_v34 = vmax.f32 %v1311_v29, %v1312_v30 }
 0x1ce   : > { %v1169_v36 = vpop.f32.mrf.mxu2  ;;  %v883_v37 = vpop.f32.mrf.mxu0 }
 0x1cf   : > { %v5923_v41 = vpack.c.bf16 %v1337_v34, %v1336_v32  ;;  %v1026_v42 = vpop.f32.mrf.mxu1  ;;  %v1229_v44 = vadd.f32 %v1169_v36, %v1024_v52  ;;  %v5061_v32 = vld [vmem:[%s6270_s2] ss:$0 sm:$0xff] }
 0x1d0   : > { %v1027_v48 = vadd.f32 %v1026_v42, %v883_v37 }
 0x1d1   : > { %1512 = vmatmul.bf16.gmra.mxu3 %v5923_v41  ;;  %v1273_v63 = vadd.f32 %v5521_v26, %v1229_v44 }
 0x1d3   : > { %v1313_v14 = vmax.f32 %v1273_v63, 0.0 }
 0x1d6   : > { %v1172_v43 = vpop.f32.mrf.mxu2  ;;  %v886_v45 = vpop.f32.mrf.mxu0 }
 0x1d7   : > { %v1029_v46 = vpop.f32.mrf.mxu1  ;;  %v1230_v56 = vadd.f32 %v1172_v43, %v1027_v48  ;;  %v4065_v48 = vld [vmem:[%s6271_s3 + $0x70] sm:$0xf] }
 0x1d8   : > { %v1030_v8 = vadd.f32 %v1029_v46, %v886_v45  ;;  %v4066_v50 = vor.u32 %v4810_v49, %v4065_v48  ;;  %v4802_v48 = vld [vmem:[%s6271_s3 + $0x34] sm:$0xf0] }
 0x1d9   : > { %1744 = vmatmul.bf16.gmra.mxu0 %v5911_v24  ;;  %v1274_v61 = vadd.f32 %v5521_v26, %v1230_v56 }
 0x1da   : > { %1896 = vmatmul.bf16.gmra.mxu1 %v5927_v47 }
 0x1db   : > { %1950 = vmatmul.bf16.gmra.mxu2 %v5927_v47  ;;  %v1314_v11 = vmax.f32 %v1274_v61, 0.0 }
 0x1dd   : > { %v1338_v17 = vmax.f32 %v1313_v14, %v1314_v11 }
 0x1de   : > { %v1175_v39 = vpop.f32.mrf.mxu2  ;;  %v889_v35 = vpop.f32.mrf.mxu0 }
 0x1df   : > { %v1032_v53 = vpop.f32.mrf.mxu1  ;;  %v1231_v59 = vadd.f32 %v1175_v39, %v1030_v8  ;;  %v5957_v31 = vpack.c.bf16 %v1338_v17, %v1337_v34  ;;  %v5971_v8 = vpop.f32.mrf.mxu3 }
 0x1e0   : > { %v1033_v60 = vadd.f32 %v1032_v53, %v889_v35 }
 0x1e1   : > { %v1275_v0 = vadd.f32 %v5521_v26, %v1231_v59 }
 0x1e3   : > { %v1315_v15 = vmax.f32 %v1275_v0, 0.0 }
 0x1e6   : > { %v1178_v62 = vpop.f32.mrf.mxu2  ;;  %v892_v4 = vpop.f32.mrf.mxu0 }
 0x1e7   : > { %v1232_v2 = vadd.f32 %v1178_v62, %v1033_v60  ;;  %v1035_v6 = vpop.f32.mrf.mxu1 }
 0x1e8   : > { %v1036_v28 = vadd.f32 %v1035_v6, %v892_v4  ;;  %v5978_v6 = vpop.f32.mrf.mxu3 }
 0x1e9   : > { %v1276_v12 = vadd.f32 %v5521_v26, %v1232_v2  ;;  %1749 = vmatmul.bf16.gmra.mxu0 %v5927_v47  ;;  %v4811_v26 = vld [vmem:[%s6271_s3 + $0x84] sm:$0xf] }
 0x1ea   : > { %1901 = vmatmul.bf16.gmra.mxu1 %v5942_v10  ;;  %v3950_v23 = vor.u32 %v4811_v26, %v3947_v22 }
 0x1eb   : > { %v1316_v16 = vmax.f32 %v1276_v12, 0.0  ;;  %1955 = vmatmul.bf16.gmra.mxu2 %v5942_v10 }
 0x1ec   : > { %1535 = vmatpush.bf16.msrb.mxu3 %v3950_v23 }
 0x1ed   : > { %v1339_v18 = vmax.f32 %v1315_v15, %v1316_v16  ;;  %v4057_v15 = vld [vmem:[%s6271_s3 + $0x60] sm:$0xf]  ;;  %v4808_v16 = vld [vmem:[%s6271_s3 + $0x64] sm:$0xf0] }
 0x1ee   : > { %v1181_v19 = vpop.f32.mrf.mxu2  ;;  %v895_v20 = vpop.f32.mrf.mxu0 }
 0x1ef   : > { %v5948_v9 = vpack.c.bf16 %v1339_v18, %v1338_v17  ;;  %v1038_v38 = vpop.f32.mrf.mxu1  ;;  %v1233_v7 = vadd.f32 %v1181_v19, %v1036_v28  ;;  %v4058_v19 = vor.u32 %v4808_v16, %v4057_v15  ;;  %v4872_v16 = vld [vmem:[#allocation3 + $0xe8] sm:$0xff] }
 0x1f0   : > { %v1039_v25 = vadd.f32 %v1038_v38, %v895_v20  ;;  %1662 = vmatpush.bf16.msra.mxu3 %v4066_v50  ;;  %v5989_v26 = vpop.f32.mrf.mxu3 }
 0x1f1   : > { %1517 = vmatmul.bf16.gmra.mxu3 %v5948_v9  ;;  %v1277_v42 = vadd.f32 %v5061_v32, %v1233_v7  ;;  %v4049_v7 = vld [vmem:[%s6271_s3 + $0x50] sm:$0xf] }
 0x1f3   : > { %v1317_v39 = vmax.f32 %v1277_v42, 0.0 }
 0x1f4   : > { %1663 = vmatpush.bf16.msra.mxu3 %v4058_v19  ;;  %v4871_v19 = vld [vmem:[#allocation3 + $0xe0] sm:$0xff] }
 0x1f6   : > { %v1184_v27 = vpop.f32.mrf.mxu2  ;;  %v898_v29 = vpop.f32.mrf.mxu0 }
 0x1f7   : > { %v1041_v30 = vpop.f32.mrf.mxu1  ;;  %v1234_v55 = vadd.f32 %v1184_v27, %v1039_v25 }
 0x1f8   : > { %v1042_v43 = vadd.f32 %v1041_v30, %v898_v29 }
 0x1f9   : > { %1754 = vmatmul.bf16.gmra.mxu0 %v5942_v10  ;;  %v1278_v36 = vadd.f32 %v5061_v32, %v1234_v55  ;;  %v5992_v55 = vpop.f32.mrf.mxu3 }
 0x1fa   : > { %1906 = vmatmul.bf16.gmra.mxu1 %v5957_v31 }
 0x1fb   : > { %1960 = vmatmul.bf16.gmra.mxu2 %v5957_v31  ;;  %v1318_v34 = vmax.f32 %v1278_v36, 0.0  ;;  %v4806_v36 = vld [vmem:[%s6271_s3 + $0x54] sm:$0xf0] }
 0x1fd   : > { %v1340_v35 = vmax.f32 %v1317_v39, %v1318_v34 }
 0x1fe   : > { %v1187_v37 = vpop.f32.mrf.mxu2  ;;  %v901_v45 = vpop.f32.mrf.mxu0 }
 0x1ff   : > { %v1044_v46 = vpop.f32.mrf.mxu1  ;;  %v1235_v51 = vadd.f32 %v1187_v37, %v1042_v43  ;;  %v5973_v62 = vpack.c.bf16 %v1340_v35, %v1339_v18  ;;  %v4804_v43 = vld [vmem:[%s6271_s3 + $0x44] sm:$0xf0] }
 0x200   : > { %v1045_v52 = vadd.f32 %v1044_v46, %v901_v45 }
 0x201   : > { %v1279_v56 = vadd.f32 %v5061_v32, %v1235_v51  ;;  %v6001_v37 = vpop.f32.mrf.mxu3  ;;  %v4800_v51 = vld [vmem:[%s6271_s3 + $0x24] sm:$0xf0] }
 0x203   : > { %v1319_v63 = vmax.f32 %v1279_v56, 0.0  ;;  %v4798_v56 = vld [vmem:[%s6271_s3 + $0x14] sm:$0xf0] }
 0x206   : > { %v1190_v53 = vpop.f32.mrf.mxu2  ;;  %v904_v59 = vpop.f32.mrf.mxu0 }
 0x207   : > { %v1236_v44 = vadd.f32 %v1190_v53, %v1045_v52  ;;  %v1047_v60 = vpop.f32.mrf.mxu1 }
 0x208   : > { %v1048_v2 = vadd.f32 %v1047_v60, %v904_v59  ;;  %v4858_v60 = vld [vmem:[#allocation3 + $0x78] sm:$0xff] }
 0x209   : > { %v1280_v61 = vadd.f32 %v5061_v32, %v1236_v44  ;;  %1759 = vmatmul.bf16.gmra.mxu0 %v5957_v31  ;;  %v6004_v42 = vpop.f32.mrf.mxu3  ;;  %2408 = vmatpush.bf16.msra.mxu2 %v4858_v60 }
 0x20a   : > { %1911 = vmatmul.bf16.gmra.mxu1 %v5973_v62 }
 0x20b   : > { %v1320_v0 = vmax.f32 %v1280_v61, 0.0  ;;  %1965 = vmatmul.bf16.gmra.mxu2 %v5973_v62 }
 0x20d   : > { %v1341_v4 = vmax.f32 %v1319_v63, %v1320_v0  ;;  %v4857_v63 = vld [vmem:[#allocation3 + $0x70] sm:$0xff]  ;;  %v4009_v0 = vld [vmem:[%s6271_s3] sm:$0xf] }
 0x20e   : > { %v1193_v11 = vpop.f32.mrf.mxu2  ;;  %v907_v17 = vpop.f32.mrf.mxu0  ;;  %2409 = vmatpush.bf16.msra.mxu2 %v4857_v63 }
 0x20f   : > { %v5980_v12 = vpack.c.bf16 %v1341_v4, %v1340_v35  ;;  %v1237_v14 = vadd.f32 %v1193_v11, %v1048_v2  ;;  %v1050_v18 = vpop.f32.mrf.mxu1  ;;  %v4796_v2 = vld [vmem:[%s6271_s3 + $0x4] sm:$0xf0]  ;;  %v4873_v11 = vld [vmem:[#allocation3 + $0xf0] sm:$0xff] }
 0x210   : > { %v1051_v20 = vadd.f32 %v1050_v18, %v907_v17  ;;  %v4855_v17 = vld [vmem:[#allocation3 + $0x60] sm:$0xff] }
 0x211   : > { %1522 = vmatmul.bf16.gmra.mxu3 %v5980_v12  ;;  %v1281_v38 = vadd.f32 %v5061_v32, %v1237_v14  ;;  %v6012_v46 = vpop.f32.mrf.mxu3 }
 0x213   : > { %v1321_v25 = vmax.f32 %v1281_v38, 0.0 }
 0x216   : > { %v1196_v22 = vpop.f32.mrf.mxu2  ;;  %v1725_v14 = vpop.f32.mrf.mxu0 }
 0x217   : > { %v1238_v23 = vadd.f32 %v1196_v22, %v1051_v20  ;;  %v4854_v20 = vld [vmem:[#allocation3 + $0x58] sm:$0xff] }
 0x219   : > { %v1282_v27 = vadd.f32 %v5061_v32, %v1238_v23  ;;  %1764 = vmatmul.bf16.gmra.mxu0 %v5973_v62  ;;  %v4050_v32 = vor.u32 %v4806_v36, %v4049_v7  ;;  %v6015_v34 = vpop.f32.mrf.mxu3  ;;  %v4853_v23 = vld [vmem:[#allocation3 + $0x50] sm:$0xff]  ;;  %v4851_v7 = vld [vmem:[#allocation3 + $0x40] sm:$0xff] }
 0x21b   : > { %v1322_v28 = vmax.f32 %v1282_v27, 0.0  ;;  %1664 = vmatpush.bf16.msra.mxu3 %v4050_v32  ;;  %v4869_v27 = vld [vmem:[#allocation3 + $0xd0] sm:$0xff]  ;;  %v4867_v32 = vld [vmem:[#allocation3 + $0xc0] sm:$0xff] }
 0x21d   : > { %v1342_v29 = vmax.f32 %v1321_v25, %v1322_v28  ;;  %v4852_v28 = vld [vmem:[#allocation3 + $0x48] sm:$0xff] }
 0x21e   : > { %v1931_v18 = vpop.f32.mrf.mxu2  ;;  %v1727_v38 = vpop.f32.mrf.mxu0 }
 0x21f   : > { %v1770_v30 = vpack.c.bf16 %v1342_v29, %v1341_v4  ;;  %v4010_v4 = vor.u32 %v4796_v2, %v4009_v0  ;;  %v4885_v2 = vld [vmem:[#allocation3 + $0x150] sm:$0xff] }
 0x221   : > { %1536 = vmatmul.bf16.vlgmr.msrb.gmra.mxu3 %v5571_v21  ;;  %1916 = vmatmul.bf16.gmra.mxu1 %v1770_v30  ;;  %v4041_v21 = vld [vmem:[%s6271_s3 + $0x40] sm:$0xf]  ;;  %v6023_v50 = vpop.f32.mrf.mxu3 }
 0x222   : > { %1970 = vmatmul.bf16.gmra.mxu2 %v1770_v30  ;;  %v4042_v45 = vor.u32 %v4804_v43, %v4041_v21  ;;  %v4868_v30 = vld [vmem:[#allocation3 + $0xc8] sm:$0xff]  ;;  %v4890_v21 = vld [vmem:[#allocation3 + $0x178] sm:$0xff] }
 0x224   : > { %1665 = vmatpush.bf16.msra.mxu3 %v4042_v45 }
 0x226   : > { %v1933_v25 = vpop.f32.mrf.mxu2  ;;  %v1730_v36 = vpop.f32.mrf.mxu0 }
 0x229   : > { %v6026_v39 = vpop.f32.mrf.mxu3 }
 0x22e   : > { %v1936_v43 = vpop.f32.mrf.mxu2 }
 0x231   : > { %1541 = vmatmul.bf16.gmra.mxu3 %v5596_v58  ;;  %v4033_v58 = vld [vmem:[%s6271_s3 + $0x30] sm:$0xf] }
 0x232   : > { %v4034_v49 = vor.u32 %v4802_v48, %v4033_v58  ;;  %v4889_v58 = vld [vmem:[#allocation3 + $0x170] sm:$0xff]  ;;  %v4888_v48 = vld [vmem:[#allocation3 + $0x168] sm:$0xff] }
 0x234   : > { %1666 = vmatpush.bf16.msra.mxu3 %v4034_v49  ;;  %v6034_v35 = vpop.f32.mrf.mxu3 }
 0x236   : > { %v1938_v49 = vpop.f32.mrf.mxu2 }
 0x23c   : > { %v6037_v53 = vpop.f32.mrf.mxu3 }
 0x241   : > { %1546 = vmatmul.bf16.gmra.mxu3 %v5621_v33  ;;  %v4025_v33 = vld [vmem:[%s6271_s3 + $0x20] sm:$0xf] }
 0x242   : > { %v4026_v52 = vor.u32 %v4800_v51, %v4025_v33  ;;  %v4887_v51 = vld [vmem:[#allocation3 + $0x160] sm:$0xff] }
 0x244   : > { %1667 = vmatpush.bf16.msra.mxu3 %v4026_v52 }
 0x251   : > { %1551 = vmatmul.bf16.gmra.mxu3 %v5779_v1  ;;  %v4017_v1 = vld [vmem:[%s6271_s3 + $0x10] sm:$0xf] }
 0x252   : > { %v4018_v44 = vor.u32 %v4798_v56, %v4017_v1  ;;  %v6070_v1 = vld [vmem:[%s6272_s4] sm:$0x3]  ;;  %v4886_v56 = vld [vmem:[#allocation3 + $0x158] sm:$0xff] }
 0x253   : > { %v6073_v63 = vperm.slane %v6070_v1, 1 }
 0x254   : > { %1668 = vmatpush.bf16.msra.mxu3 %v4018_v44  ;;  %v6045_v59 = vpop.f32.mrf.mxu3  ;;  %v4906_v44 = vld [vmem:[#allocation3 + $0x1f8] sm:$0xff] }
 0x258   : > { %1669 = vmatpush.bf16.msra.mxu3 %v4010_v4  ;;  %v4905_v4 = vld [vmem:[#allocation3 + $0x1f0] sm:$0xff] }
 0x25c   : > { %v6048_v61 = vpop.f32.mrf.mxu3 }
 0x261   : > { %1556 = vmatmul.bf16.gmra.mxu3 %v5862_v57  ;;  %v4874_v57 = vld [vmem:[#allocation3 + $0xf8] sm:$0xff] }
 0x262   : > { %2286 = vmatpush.bf16.msra.mxu0 %v4874_v57 }
 0x266   : > { %2287 = vmatpush.bf16.msra.mxu0 %v4873_v11  ;;  %v1941_v11 = vpop.f32.mrf.mxu2 }
 0x26a   : > { %2288 = vmatpush.bf16.msra.mxu0 %v4872_v16 }
 0x26e   : > { %2289 = vmatpush.bf16.msra.mxu0 %v4871_v19 }
 0x271   : > { %1561 = vmatmul.bf16.gmra.mxu3 %v5894_v54  ;;  %v4856_v54 = vld [vmem:[#allocation3 + $0x68] sm:$0xff] }
 0x272   : > { %2410 = vmatpush.bf16.msra.mxu2 %v4856_v54 }
 0x274   : > { %v6057_v15 = vpop.f32.mrf.mxu3 }
 0x276   : > { %2411 = vmatpush.bf16.msra.mxu2 %v4855_v17  ;;  %v4884_v17 = vld [vmem:[#allocation3 + $0x148] sm:$0xff] }
 0x27a   : > { %2412 = vmatpush.bf16.msra.mxu2 %v4854_v20 }
 0x27c   : > { %v6059_v22 = vpop.f32.mrf.mxu3 }
 0x27e   : > { %2413 = vmatpush.bf16.msra.mxu2 %v4853_v23 }
 0x281   : > { %1566 = vmatmul.bf16.gmra.mxu3 %v5923_v41  ;;  %v4870_v41 = vld [vmem:[#allocation3 + $0xd8] sm:$0xff] }
 0x282   : > { %2290 = vmatpush.bf16.msra.mxu0 %v4870_v41  ;;  %2414 = vmatpush.bf16.msra.mxu2 %v4852_v28  ;;  %v4903_v28 = vld [vmem:[#allocation3 + $0x1e0] sm:$0xff] }
 0x286   : > { %2291 = vmatpush.bf16.msra.mxu0 %v4869_v27  ;;  %2415 = vmatpush.bf16.msra.mxu2 %v4851_v7  ;;  %v4883_v27 = vld [vmem:[#allocation3 + $0x140] sm:$0xff] }
 0x28a   : > { %2292 = vmatpush.bf16.msra.mxu0 %v4868_v30  ;;  %2723 = vmatpush.bf16.msrb.mxu2 %v4906_v44 }
 0x28e   : > { %2293 = vmatpush.bf16.msra.mxu0 %v4867_v32  ;;  %2724 = vmatpush.bf16.msrb.mxu2 %v4905_v4  ;;  %v4902_v32 = vld [vmem:[#allocation3 + $0x1d8] sm:$0xff] }
 0x28f   : > { %v4922_v4 = vld [vmem:[#allocation3 + $0x278] sm:$0xff] }
 0x291   : > { %1571 = vmatmul.bf16.gmra.mxu3 %v5948_v9  ;;  %v1732_v9 = vpop.f32.mrf.mxu0 }
 0x292   : > { %2565 = vmatpush.bf16.msrb.mxu0 %v4890_v21 }
 0x294   : > { %v6062_v29 = vpop.f32.mrf.mxu3 }
 0x296   : > { %2566 = vmatpush.bf16.msrb.mxu0 %v4889_v58 }
 0x299   : > { %v1735_v60 = vpop.f32.mrf.mxu0 }
 0x29a   : > { %2567 = vmatpush.bf16.msrb.mxu0 %v4888_v48  ;;  %v4901_v48 = vld [vmem:[#allocation3 + $0x1d0] sm:$0xff] }
 0x29c   : > { %v6064_v45 = vpop.f32.mrf.mxu3 }
 0x29e   : > { %2568 = vmatpush.bf16.msrb.mxu0 %v4887_v51 }
 0x2a1   : > { %1576 = vmatmul.bf16.gmra.mxu3 %v5980_v12  ;;  %v1737_v41 = vpop.f32.mrf.mxu0 }
 0x2a2   : > { %2569 = vmatpush.bf16.msrb.mxu0 %v4886_v56 }
 0x2a4   : > { %v1537_v33 = vpop.f32.mrf.mxu3 }
 0x2a5   : > { %v1726_v52 = vadd.f32 %v1725_v14, %v1537_v33 }
 0x2a6   : > { %2570 = vmatpush.bf16.msrb.mxu0 %v4885_v2  ;;  %v4899_v2 = vld [vmem:[#allocation3 + $0x1c0] sm:$0xff] }
 0x2a7   : > { %v1977_v57 = vadd.f32 %v1931_v18, %v1726_v52  ;;  %v4904_v18 = vld [vmem:[#allocation3 + $0x1e8] sm:$0xff] }
 0x2a8   : > { %2725 = vmatpush.bf16.msrb.mxu2 %v4904_v18 }
 0x2a9   : > { %v2019_v54 = vadd.f32 %v6073_v63, %v1977_v57  ;;  %v1740_v33 = vpop.f32.mrf.mxu0 }
 0x2aa   : > { %2571 = vmatpush.bf16.msrb.mxu0 %v4884_v17 }
 0x2ab   : > { %v2055_v19 = vmax.f32 %v2019_v54, 0.0 }
 0x2ac   : > { %v1539_v12 = vpop.f32.mrf.mxu3  ;;  %2726 = vmatpush.bf16.msrb.mxu2 %v4903_v28  ;;  %v4936_v28 = vld [vmem:[#allocation3 + $0x2e8] sm:$0xff] }
 0x2ad   : > { %v1728_v0 = vadd.f32 %v1727_v38, %v1539_v12 }
 0x2ae   : > { %2572 = vmatpush.bf16.msrb.mxu0 %v4883_v27 }
 0x2af   : > { %v1979_v14 = vadd.f32 %v1933_v25, %v1728_v0  ;;  %v1943_v25 = vpop.f32.mrf.mxu2 }
 0x2b0   : > { %2727 = vmatpush.bf16.msrb.mxu2 %v4902_v32 }
 0x2b1   : > { %v2021_v16 = vadd.f32 %v6073_v63, %v1979_v14  ;;  %1670 = vmatmul.bf16.vlgmr.msra.gmra.mxu3 %v5559_v3  ;;  %v1742_v14 = vpop.f32.mrf.mxu0 }
 0x2b3   : > { %v2057_v20 = vmax.f32 %v2021_v16, 0.0  ;;  %v4921_v16 = vld [vmem:[#allocation3 + $0x270] sm:$0xff] }
 0x2b4   : > { %v1542_v38 = vpop.f32.mrf.mxu3  ;;  %2728 = vmatpush.bf16.msrb.mxu2 %v4901_v48  ;;  %v4918_v48 = vld [vmem:[#allocation3 + $0x258] sm:$0xff] }
 0x2b5   : > { %v2091_v23 = vmax.f32 %v2055_v19, %v2057_v20  ;;  %v1731_v7 = vadd.f32 %v1730_v36, %v1542_v38  ;;  %v4900_v36 = vld [vmem:[#allocation3 + $0x1c8] sm:$0xff]  ;;  %v4937_v20 = vld [vmem:[#allocation3 + $0x2f0] sm:$0xff] }
 0x2b6   : > { %v4920_v38 = vld [vmem:[#allocation3 + $0x268] sm:$0xff] }
 0x2b7   : > { %v2109_v30 = vpack.c.bf16 %v2091_v23, %v2091_v23  ;;  %v1981_v21 = vadd.f32 %v1936_v43, %v1731_v7  ;;  %v1946_v44 = vpop.f32.mrf.mxu2  ;;  %v4919_v7 = vld [vmem:[#allocation3 + $0x260] sm:$0xff] }
 0x2b8   : > { %2729 = vmatpush.bf16.msrb.mxu2 %v4900_v36  ;;  %v4866_v36 = vld [vmem:[#allocation3 + $0xb8] sm:$0xff] }
 0x2b9   : > { %2416 = vmatmul.bf16.vlgmr.msra.gmra.mxu2 %v2109_v30  ;;  %v2023_v51 = vadd.f32 %v6073_v63, %v1981_v21  ;;  %v1745_v30 = vpop.f32.mrf.mxu0  ;;  %2273 = vmatpush.bf16.msrb.mxu3 %v4866_v36 }
 0x2bb   : > { %v2059_v57 = vmax.f32 %v2023_v51, 0.0 }
 0x2bc   : > { %v1544_v3 = vpop.f32.mrf.mxu3  ;;  %2730 = vmatpush.bf16.msrb.mxu2 %v4899_v2  ;;  %v4916_v2 = vld [vmem:[#allocation3 + $0x248] sm:$0xff] }
 0x2bd   : > { %v1733_v58 = vadd.f32 %v1732_v9, %v1544_v3  ;;  %v4935_v3 = vld [vmem:[#allocation3 + $0x2e0] sm:$0xff] }
 0x2bf   : > { %v1983_v52 = vadd.f32 %v1938_v49, %v1733_v58  ;;  %v4938_v49 = vld [vmem:[#allocation3 + $0x2f8] sm:$0xff] }
 0x2c0   : > { %3039 = vmatpush.bf16.msra.mxu2 %v4938_v49  ;;  %v4932_v49 = vld [vmem:[#allocation3 + $0x2c8] sm:$0xff] }
 0x2c1   : > { %v2025_v56 = vadd.f32 %v6073_v63, %v1983_v52  ;;  %1675 = vmatmul.bf16.gmra.mxu3 %v5584_v40  ;;  %v1948_v40 = vpop.f32.mrf.mxu2  ;;  %v4934_v52 = vld [vmem:[#allocation3 + $0x2d8] sm:$0xff] }
 0x2c3   : > { %v2061_v12 = vmax.f32 %v2025_v56, 0.0 }
 0x2c4   : > { %v1547_v0 = vpop.f32.mrf.mxu3  ;;  %3040 = vmatpush.bf16.msra.mxu2 %v4937_v20  ;;  %v4931_v20 = vld [vmem:[#allocation3 + $0x2c0] sm:$0xff] }
 0x2c5   : > { %v2093_v43 = vmax.f32 %v2059_v57, %v2061_v12  ;;  %v1736_v54 = vadd.f32 %v1735_v60, %v1547_v0  ;;  %v1747_v57 = vpop.f32.mrf.mxu0 }
 0x2c7   : > { %v2143_v9 = vpack.c.bf16 %v2093_v43, %v2093_v43  ;;  %v1985_v17 = vadd.f32 %v1941_v11, %v1736_v54  ;;  %v4933_v43 = vld [vmem:[#allocation3 + $0x2d0] sm:$0xff] }
 0x2c8   : > { %3041 = vmatpush.bf16.msra.mxu2 %v4936_v28 }
 0x2c9   : > { %2294 = vmatmul.bf16.vlgmr.msra.gmra.mxu0 %v2143_v9  ;;  %v2027_v23 = vadd.f32 %v6073_v63, %v1985_v17  ;;  %v1951_v58 = vpop.f32.mrf.mxu2 }
 0x2ca   : > { %2881 = vmatpush.bf16.msra.mxu0 %v4922_v4 }
 0x2cb   : > { %v2063_v11 = vmax.f32 %v2027_v23, 0.0 }
 0x2cc   : > { %v1549_v18 = vpop.f32.mrf.mxu3  ;;  %3042 = vmatpush.bf16.msra.mxu2 %v4935_v3 }
 0x2cd   : > { %v1738_v19 = vadd.f32 %v1737_v41, %v1549_v18  ;;  %v4954_v18 = vld [vmem:[#allocation3 + $0x378] sm:$0xff] }
 0x2ce   : > { %2882 = vmatpush.bf16.msra.mxu0 %v4921_v16 }
 0x2cf   : > { %v1987_v27 = vadd.f32 %v1943_v25, %v1738_v19 }
 0x2d0   : > { %3043 = vmatpush.bf16.msra.mxu2 %v4934_v52 }
 0x2d1   : > { %v2029_v60 = vadd.f32 %v6073_v63, %v1987_v27  ;;  %1680 = vmatmul.bf16.gmra.mxu3 %v5609_v13  ;;  %v4917_v13 = vld [vmem:[#allocation3 + $0x250] sm:$0xff] }
 0x2d2   : > { %2883 = vmatpush.bf16.msra.mxu0 %v4920_v38  ;;  %v1750_v38 = vpop.f32.mrf.mxu0  ;;  %v4953_v27 = vld [vmem:[#allocation3 + $0x370] sm:$0xff] }
 0x2d3   : > { %v2065_v32 = vmax.f32 %v2029_v60, 0.0  ;;  %v4970_v60 = vld [vmem:[#allocation3 + $0x3f8] sm:$0xff] }
 0x2d4   : > { %v1552_v21 = vpop.f32.mrf.mxu3  ;;  %3044 = vmatpush.bf16.msra.mxu2 %v4933_v43 }
 0x2d5   : > { %v2095_v41 = vmax.f32 %v2063_v11, %v2065_v32  ;;  %v1741_v25 = vadd.f32 %v1740_v33, %v1552_v21  ;;  %v1953_v33 = vpop.f32.mrf.mxu2  ;;  %v4865_v11 = vld [vmem:[#allocation3 + $0xb0] sm:$0xff] }
 0x2d6   : > { %2884 = vmatpush.bf16.msra.mxu0 %v4919_v7  ;;  %v4952_v7 = vld [vmem:[#allocation3 + $0x368] sm:$0xff]  ;;  %2274 = vmatpush.bf16.msrb.mxu3 %v4865_v11 }
 0x2d7   : > { %v2422_v51 = vpack.c.bf16 %v2095_v41, %v2095_v41  ;;  %v1989_v56 = vadd.f32 %v1946_v44, %v1741_v25  ;;  %v4915_v44 = vld [vmem:[#allocation3 + $0x240] sm:$0xff]  ;;  %v4969_v41 = vld [vmem:[#allocation3 + $0x3f0] sm:$0xff] }
 0x2d8   : > { %3045 = vmatpush.bf16.msra.mxu2 %v4932_v49  ;;  %v4948_v49 = vld [vmem:[#allocation3 + $0x348] sm:$0xff] }
 0x2d9   : > { %2573 = vmatmul.bf16.vlgmr.msrb.gmra.mxu0 %v2422_v51  ;;  %v2031_v4 = vadd.f32 %v6073_v63, %v1989_v56  ;;  %v4950_v56 = vld [vmem:[#allocation3 + $0x358] sm:$0xff] }
 0x2da   : > { %2885 = vmatpush.bf16.msra.mxu0 %v4918_v48  ;;  %v1752_v51 = vpop.f32.mrf.mxu0 }
 0x2db   : > { %v2067_v16 = vmax.f32 %v2031_v4, 0.0  ;;  %v4850_v4 = vld [vmem:[#allocation3 + $0x38] sm:$0xff] }
 0x2dc   : > { %v1554_v12 = vpop.f32.mrf.mxu3  ;;  %3046 = vmatpush.bf16.msra.mxu2 %v4931_v20  ;;  %2395 = vmatpush.bf16.msra.mxu1 %v4850_v4  ;;  %v4947_v20 = vld [vmem:[#allocation3 + $0x340] sm:$0xff] }
 0x2dd   : > { %v1743_v0 = vadd.f32 %v1742_v14, %v1554_v12 }
 0x2de   : > { %2886 = vmatpush.bf16.msra.mxu0 %v4917_v13 }
 0x2df   : > { %v1991_v9 = vadd.f32 %v1948_v40, %v1743_v0  ;;  %v4967_v0 = vld [vmem:[#allocation3 + $0x3e0] sm:$0xff] }
 0x2e1   : > { %v2033_v54 = vadd.f32 %v6073_v63, %v1991_v9  ;;  %1685 = vmatmul.bf16.gmra.mxu3 %v5676_v5  ;;  %v1956_v5 = vpop.f32.mrf.mxu2  ;;  %v4949_v9 = vld [vmem:[#allocation3 + $0x350] sm:$0xff] }
 0x2e2   : > { %2887 = vmatpush.bf16.msra.mxu0 %v4916_v2 }
 0x2e3   : > { %v2069_v17 = vmax.f32 %v2033_v54, 0.0 }
 0x2e4   : > { %v1557_v14 = vpop.f32.mrf.mxu3 }
 0x2e5   : > { %v2097_v19 = vmax.f32 %v2067_v16, %v2069_v17  ;;  %v1746_v40 = vadd.f32 %v1745_v30, %v1557_v14  ;;  %v4951_v30 = vld [vmem:[#allocation3 + $0x360] sm:$0xff]  ;;  %v4965_v17 = vld [vmem:[#allocation3 + $0x3d0] sm:$0xff] }
 0x2e6   : > { %2888 = vmatpush.bf16.msra.mxu0 %v4915_v44 }
 0x2e7   : > { %v2580_v23 = vpack.c.bf16 %v2097_v19, %v2097_v19  ;;  %v1993_v28 = vadd.f32 %v1951_v58, %v1746_v40  ;;  %v4968_v58 = vld [vmem:[#allocation3 + $0x3e8] sm:$0xff] }
 0x2e8   : > { %v4964_v40 = vld [vmem:[#allocation3 + $0x3c8] sm:$0xff] }
 0x2e9   : > { %2731 = vmatmul.bf16.vlgmr.msrb.gmra.mxu2 %v2580_v23  ;;  %v2035_v3 = vadd.f32 %v6073_v63, %v1993_v28  ;;  %v1958_v36 = vpop.f32.mrf.mxu2 }
 0x2ea   : > { %3197 = vmatpush.bf16.msrb.mxu0 %v4954_v18  ;;  %3355 = vmatpush.bf16.msrb.mxu2 %v4970_v60 }
 0x2eb   : > { %v2071_v52 = vmax.f32 %v2035_v3, 0.0  ;;  %v4864_v3 = vld [vmem:[#allocation3 + $0xa8] sm:$0xff] }
 0x2ec   : > { %v1559_v32 = vpop.f32.mrf.mxu3  ;;  %2275 = vmatpush.bf16.msrb.mxu3 %v4864_v3 }
 0x2ed   : > { %v1748_v21 = vadd.f32 %v1747_v57, %v1559_v32  ;;  %v4963_v32 = vld [vmem:[#allocation3 + $0x3c0] sm:$0xff] }
 0x2ee   : > { %3198 = vmatpush.bf16.msrb.mxu0 %v4953_v27  ;;  %3356 = vmatpush.bf16.msrb.mxu2 %v4969_v41 }
 0x2ef   : > { %v1995_v48 = vadd.f32 %v1953_v33, %v1748_v21  ;;  %v4966_v33 = vld [vmem:[#allocation3 + $0x3d8] sm:$0xff] }
 0x2f1   : > { %v2037_v25 = vadd.f32 %v6073_v63, %v1995_v48  ;;  %1690 = vmatmul.bf16.gmra.mxu3 %v5911_v24  ;;  %v1755_v24 = vpop.f32.mrf.mxu0  ;;  %v1961_v18 = vpop.f32.mrf.mxu2  ;;  %v4849_v48 = vld [vmem:[#allocation3 + $0x30] sm:$0xff] }
 0x2f2   : > { %3199 = vmatpush.bf16.msrb.mxu0 %v4952_v7  ;;  %3357 = vmatpush.bf16.msrb.mxu2 %v4968_v58  ;;  %v4985_v7 = vld [vmem:[#allocation3 + $0x470] sm:$0xff]  ;;  %v4983_v58 = vld [vmem:[#allocation3 + $0x460] sm:$0xff] }
 0x2f3   : > { %v2073_v13 = vmax.f32 %v2037_v25, 0.0  ;;  %2396 = vmatpush.bf16.msra.mxu1 %v4849_v48 }
 0x2f4   : > { %v1562_v57 = vpop.f32.mrf.mxu3 }
 0x2f5   : > { %v2099_v12 = vmax.f32 %v2071_v52, %v2073_v13  ;;  %v1751_v2 = vadd.f32 %v1750_v38, %v1562_v57  ;;  %v4986_v38 = vld [vmem:[#allocation3 + $0x478] sm:$0xff] }
 0x2f6   : > { %3200 = vmatpush.bf16.msrb.mxu0 %v4951_v30  ;;  %3358 = vmatpush.bf16.msrb.mxu2 %v4967_v0  ;;  %v4982_v57 = vld [vmem:[#allocation3 + $0x458] sm:$0xff]  ;;  %v4848_v0 = vld [vmem:[#allocation3 + $0x28] sm:$0xff] }
 0x2f7   : > { %v2738_v43 = vpack.c.bf16 %v2099_v12, %v2099_v12  ;;  %v1997_v54 = vadd.f32 %v1956_v5, %v1751_v2  ;;  %2397 = vmatpush.bf16.msra.mxu1 %v4848_v0 }
 0x2f9   : > { %2889 = vmatmul.bf16.vlgmr.msra.gmra.mxu0 %v2738_v43  ;;  %v2039_v14 = vadd.f32 %v6073_v63, %v1997_v54  ;;  %v1757_v5 = vpop.f32.mrf.mxu0  ;;  %v1963_v30 = vpop.f32.mrf.mxu2 }
 0x2fa   : > { %3201 = vmatpush.bf16.msrb.mxu0 %v4950_v56  ;;  %3359 = vmatpush.bf16.msrb.mxu2 %v4966_v33  ;;  %v4981_v33 = vld [vmem:[#allocation3 + $0x450] sm:$0xff] }
 0x2fb   : > { %v2075_v27 = vmax.f32 %v2039_v14, 0.0  ;;  %v4980_v14 = vld [vmem:[#allocation3 + $0x448] sm:$0xff] }
 0x2fc   : > { %v1564_v44 = vpop.f32.mrf.mxu3 }
 0x2fd   : > { %v1753_v16 = vadd.f32 %v1752_v51, %v1564_v44  ;;  %v4984_v51 = vld [vmem:[#allocation3 + $0x468] sm:$0xff] }
 0x2fe   : > { %3202 = vmatpush.bf16.msrb.mxu0 %v4949_v9  ;;  %3360 = vmatpush.bf16.msrb.mxu2 %v4965_v17  ;;  %v4863_v17 = vld [vmem:[#allocation3 + $0xa0] sm:$0xff] }
 0x2ff   : > { %v1999_v19 = vadd.f32 %v1958_v36, %v1753_v16  ;;  %2276 = vmatpush.bf16.msrb.mxu3 %v4863_v17 }
 0x301   : > { %v2041_v23 = vadd.f32 %v6073_v63, %v1999_v19  ;;  %1695 = vmatmul.bf16.gmra.mxu3 %v5927_v47  ;;  %v1760_v13 = vpop.f32.mrf.mxu0  ;;  %v1966_v43 = vpop.f32.mrf.mxu2 }
 0x302   : > { %3203 = vmatpush.bf16.msrb.mxu0 %v4948_v49  ;;  %3361 = vmatpush.bf16.msrb.mxu2 %v4964_v40  ;;  %v4847_v49 = vld [vmem:[#allocation3 + $0x20] sm:$0xff]  ;;  %v4862_v40 = vld [vmem:[#allocation3 + $0x98] sm:$0xff] }
 0x303   : > { %v2077_v60 = vmax.f32 %v2041_v23, 0.0  ;;  %2398 = vmatpush.bf16.msra.mxu1 %v4847_v49  ;;  %v4979_v23 = vld [vmem:[#allocation3 + $0x440] sm:$0xff]  ;;  %2277 = vmatpush.bf16.msrb.mxu3 %v4862_v40  ;;  %v4880_v49 = vld [vmem:[#allocation3 + $0x128] sm:$0xff] }
 0x304   : > { %v1567_v28 = vpop.f32.mrf.mxu3 }
 0x305   : > { %v2101_v11 = vmax.f32 %v2075_v27, %v2077_v60  ;;  %v1756_v41 = vadd.f32 %v1755_v24, %v1567_v28  ;;  %v6096_v24 = vpop.f32.mrf.mxu1  ;;  %v4845_v60 = vld [vmem:[#allocation3 + $0x10] sm:$0xff] }
 0x306   : > { %3204 = vmatpush.bf16.msrb.mxu0 %v4947_v20  ;;  %3362 = vmatpush.bf16.msrb.mxu2 %v4963_v32 }
 0x307   : > { %v2896_v21 = vpack.c.bf16 %v2101_v11, %v2101_v11  ;;  %v2001_v47 = vadd.f32 %v1961_v18, %v1756_v41  ;;  %v4861_v11 = vld [vmem:[#allocation3 + $0x90] sm:$0xff] }
 0x308   : > { %2278 = vmatpush.bf16.msrb.mxu3 %v4861_v11  ;;  %v4897_v11 = vld [vmem:[#allocation3 + $0x1b0] sm:$0xff] }
 0x309   : > { %3047 = vmatmul.bf16.vlgmr.msra.gmra.mxu2 %v2896_v21  ;;  %v2043_v56 = vadd.f32 %v6073_v63, %v2001_v47  ;;  %v1762_v18 = vpop.f32.mrf.mxu0  ;;  %v1968_v20 = vpop.f32.mrf.mxu2  ;;  %v4844_v21 = vld [vmem:[#allocation3 + $0x8] sm:$0xff] }
 0x30a   : > { %3513 = vmatpush.bf16.msra.mxu0 %v4986_v38  ;;  %v4860_v47 = vld [vmem:[#allocation3 + $0x88] sm:$0xff] }
 0x30b   : > { %v2079_v2 = vmax.f32 %v2043_v56, 0.0  ;;  %v4859_v56 = vld [vmem:[#allocation3 + $0x80] sm:$0xff] }
 0x30c   : > { %v1569_v25 = vpop.f32.mrf.mxu3  ;;  %2279 = vmatpush.bf16.msrb.mxu3 %v4860_v47  ;;  %v4895_v47 = vld [vmem:[#allocation3 + $0x1a0] sm:$0xff] }
 0x30d   : > { %v1758_v52 = vadd.f32 %v1757_v5, %v1569_v25  ;;  %v6098_v5 = vpop.f32.mrf.mxu1 }
 0x30e   : > { %3514 = vmatpush.bf16.msra.mxu0 %v4985_v7 }
 0x30f   : > { %v2003_v36 = vadd.f32 %v1963_v30, %v1758_v52 }
 0x310   : > { %2280 = vmatpush.bf16.msrb.mxu3 %v4859_v56 }
 0x311   : > { %v2045_v12 = vadd.f32 %v6073_v63, %v2003_v36  ;;  %1700 = vmatmul.bf16.gmra.mxu3 %v5942_v10  ;;  %v4846_v10 = vld [vmem:[#allocation3 + $0x18] sm:$0xff]  ;;  %v1765_v41 = vpop.f32.mrf.mxu0  ;;  %v1971_v30 = vpop.f32.mrf.mxu2 }
 0x312   : > { %3515 = vmatpush.bf16.msra.mxu0 %v4984_v51  ;;  %2399 = vmatpush.bf16.msra.mxu1 %v4846_v10  ;;  %v4879_v10 = vld [vmem:[#allocation3 + $0x120] sm:$0xff] }
 0x313   : > { %v2081_v4 = vmax.f32 %v2045_v12, 0.0 }
 0x314   : > { %v1572_v9 = vpop.f32.mrf.mxu3 }
 0x315   : > { %v2103_v54 = vmax.f32 %v2079_v2, %v2081_v4  ;;  %v1761_v16 = vadd.f32 %v1760_v13, %v1572_v9  ;;  %v6103_v36 = vpop.f32.mrf.mxu1  ;;  %v4881_v2 = vld [vmem:[#allocation3 + $0x130] sm:$0xff] }
 0x316   : > { %3516 = vmatpush.bf16.msra.mxu0 %v4983_v58  ;;  %2400 = vmatpush.bf16.msra.mxu1 %v4845_v60  ;;  %v4843_v58 = vld [vmem:[#allocation3] sm:$0xff] }
 0x317   : > { %v3054_v44 = vpack.c.bf16 %v2103_v54, %v2103_v54  ;;  %v2005_v19 = vadd.f32 %v1966_v43, %v1761_v16 }
 0x319   : > { %3205 = vmatmul.bf16.vlgmr.msrb.gmra.mxu0 %v3054_v44  ;;  %v2047_v28 = vadd.f32 %v6073_v63, %v2005_v19  ;;  %v1767_v12 = vpop.f32.mrf.mxu0  ;;  %v1973_v4 = vpop.f32.mrf.mxu2 }
 0x31a   : > { %3517 = vmatpush.bf16.msra.mxu0 %v4982_v57  ;;  %2401 = vmatpush.bf16.msra.mxu1 %v4844_v21  ;;  %v4896_v21 = vld [vmem:[#allocation3 + $0x1a8] sm:$0xff] }
 0x31b   : > { %v2083_v3 = vmax.f32 %v2047_v28, 0.0 }
 0x31c   : > { %v1574_v38 = vpop.f32.mrf.mxu3 }
 0x31d   : > { %v1763_v27 = vadd.f32 %v1762_v18, %v1574_v38  ;;  %v1884_v44 = vpop.f32.mrf.mxu1  ;;  %v4878_v38 = vld [vmem:[#allocation3 + $0x118] sm:$0xff] }
 0x31e   : > { %3518 = vmatpush.bf16.msra.mxu0 %v4981_v33  ;;  %2402 = vmatpush.bf16.msra.mxu1 %v4843_v58 }
 0x31f   : > { %v2007_v7 = vadd.f32 %v1968_v20, %v1763_v27 }
 0x321   : > { %v2049_v32 = vadd.f32 %v6073_v63, %v2007_v7  ;;  %1705 = vmatmul.bf16.gmra.mxu3 %v5957_v31  ;;  %v4882_v31 = vld [vmem:[#allocation3 + $0x138] sm:$0xff]  ;;  %v4877_v7 = vld [vmem:[#allocation3 + $0x110] sm:$0xff] }
 0x322   : > { %3519 = vmatpush.bf16.msra.mxu0 %v4980_v14  ;;  %2552 = vmatpush.bf16.msra.mxu3 %v4882_v31 }
 0x323   : > { %v2085_v48 = vmax.f32 %v2049_v32, 0.0 }
 0x324   : > { %v1577_v51 = vpop.f32.mrf.mxu3 }
 0x325   : > { %v2105_v25 = vmax.f32 %v2083_v3, %v2085_v48  ;;  %v1766_v13 = vadd.f32 %v1765_v41, %v1577_v51  ;;  %v1887_v60 = vpop.f32.mrf.mxu1 }
 0x326   : > { %3520 = vmatpush.bf16.msra.mxu0 %v4979_v23  ;;  %2553 = vmatpush.bf16.msra.mxu3 %v4881_v2  ;;  %v4898_v23 = vld [vmem:[#allocation3 + $0x1b8] sm:$0xff] }
 0x327   : > { %v3212_v52 = vpack.c.bf16 %v2105_v25, %v2105_v25  ;;  %v2009_v57 = vadd.f32 %v1971_v30, %v1766_v13  ;;  %2710 = vmatpush.bf16.msrb.mxu1 %v4898_v23  ;;  %v4894_v13 = vld [vmem:[#allocation3 + $0x198] sm:$0xff] }
 0x329   : > { %3363 = vmatmul.bf16.vlgmr.msrb.gmra.mxu2 %v3212_v52  ;;  %v2051_v9 = vadd.f32 %v6073_v63, %v2009_v57 }
 0x32a   : > { %2554 = vmatpush.bf16.msra.mxu3 %v4880_v49 }
 0x32b   : > { %v2087_v16 = vmax.f32 %v2051_v9, 0.0  ;;  %2711 = vmatpush.bf16.msrb.mxu1 %v4897_v11 }
 0x32c   : > { %v1579_v0 = vpop.f32.mrf.mxu3 }
 0x32d   : > { %v1768_v43 = vadd.f32 %v1767_v12, %v1579_v0  ;;  %v1889_v58 = vpop.f32.mrf.mxu1  ;;  %v4893_v12 = vld [vmem:[#allocation3 + $0x190] sm:$0xff] }
 0x32e   : > { %2555 = vmatpush.bf16.msra.mxu3 %v4879_v10  ;;  %v4913_v10 = vld [vmem:[#allocation3 + $0x230] sm:$0xff] }
 0x32f   : > { %v2011_v33 = vadd.f32 %v1973_v4, %v1768_v43  ;;  %2712 = vmatpush.bf16.msrb.mxu1 %v4896_v21 }
 0x331   : > { %v2053_v54 = vadd.f32 %v6073_v63, %v2011_v33  ;;  %1710 = vmatmul.bf16.gmra.mxu3 %v5973_v62  ;;  %v6111_v63 = vperm.slane %v6070_v1, 0  ;;  %v4876_v1 = vld [vmem:[#allocation3 + $0x108] sm:$0xff] }
 0x332   : > { %2556 = vmatpush.bf16.msra.mxu3 %v4878_v38 }
 0x333   : > { %v2089_v17 = vmax.f32 %v2053_v54, 0.0  ;;  %2713 = vmatpush.bf16.msrb.mxu1 %v4895_v47 }
 0x334   : > { %v1671_v18 = vpop.f32.mrf.mxu3 }
 0x335   : > { %v2107_v14 = vmax.f32 %v2087_v16, %v2089_v17  ;;  %v1672_v20 = vadd.f32 %v1671_v18, %v5971_v8  ;;  %v1892_v4 = vpop.f32.mrf.mxu1  ;;  %v4914_v18 = vld [vmem:[#allocation3 + $0x238] sm:$0xff] }
 0x336   : > { %2557 = vmatpush.bf16.msra.mxu3 %v4877_v7 }
 0x337   : > { %v3370_v19 = vpack.c.bf16 %v2107_v14, %v2107_v14  ;;  %v1976_v40 = vadd.f32 %v6096_v24, %v1672_v20  ;;  %2714 = vmatpush.bf16.msrb.mxu1 %v4894_v13  ;;  %v4925_v13 = vld [vmem:[#allocation3 + $0x290] sm:$0xff] }
 0x339   : > { %3521 = vmatmul.bf16.vlgmr.msra.gmra.mxu0 %v3370_v19  ;;  %v2018_v8 = vadd.f32 %v6111_v63, %v1976_v40  ;;  %v4929_v40 = vld [vmem:[#allocation3 + $0x2b0] sm:$0xff] }
 0x33a   : > { %2558 = vmatpush.bf16.msra.mxu3 %v4876_v1 }
 0x33b   : > { %v2054_v41 = vmax.f32 %v2018_v8, 0.0  ;;  %2715 = vmatpush.bf16.msrb.mxu1 %v4893_v12  ;;  %v4928_v8 = vld [vmem:[#allocation3 + $0x2a8] sm:$0xff] }
 0x33c   : > { %v1673_v62 = vpop.f32.mrf.mxu3  ;;  %v6113_v27 = vpop.f32.mrf.mxu2 }
 0x33d   : > { %v1674_v28 = vadd.f32 %v1673_v62, %v5978_v6  ;;  %v4875_v6 = vld [vmem:[#allocation3 + $0x100] sm:$0xff]  ;;  %v1894_v19 = vpop.f32.mrf.mxu1 }
 0x33e   : > { %2559 = vmatpush.bf16.msra.mxu3 %v4875_v6  ;;  %v4909_v6 = vld [vmem:[#allocation3 + $0x210] sm:$0xff] }
 0x33f   : > { %v1978_v32 = vadd.f32 %v6098_v5, %v1674_v28  ;;  %v4912_v28 = vld [vmem:[#allocation3 + $0x228] sm:$0xff] }
 0x341   : > { %v2020_v24 = vadd.f32 %v6111_v63, %v1978_v32  ;;  %v4911_v32 = vld [vmem:[#allocation3 + $0x220] sm:$0xff] }
 0x343   : > { %v2056_v3 = vmax.f32 %v2020_v24, 0.0 }
 0x344   : > { %v1676_v48 = vpop.f32.mrf.mxu3  ;;  %v2419_v30 = vpop.f32.mrf.mxu2 }
 0x345   : > { %v2090_v51 = vmax.f32 %v2054_v41, %v2056_v3  ;;  %v1677_v5 = vadd.f32 %v1676_v48, %v5989_v26  ;;  %v4892_v26 = vld [vmem:[#allocation3 + $0x188] sm:$0xff]  ;;  %v1897_v21 = vpop.f32.mrf.mxu1  ;;  %v4910_v3 = vld [vmem:[#allocation3 + $0x218] sm:$0xff] }
 0x346   : > { %v6119_v25 = vpop.f32.mrf.mxu0  ;;  %2716 = vmatpush.bf16.msrb.mxu1 %v4892_v26 }
 0x347   : > { %v2108_v52 = vpack.c.bf16 %v2090_v51, %v2090_v51  ;;  %v1980_v56 = vadd.f32 %v6103_v36, %v1677_v5  ;;  %v4891_v36 = vld [vmem:[#allocation3 + $0x180] sm:$0xff]  ;;  %v4926_v51 = vld [vmem:[#allocation3 + $0x298] sm:$0xff] }
 0x349   : > { %2403 = vmatmul.bf16.vlgmr.msra.gmra.mxu1 %v2108_v52  ;;  %v2022_v43 = vadd.f32 %v6111_v63, %v1980_v56  ;;  %v4908_v56 = vld [vmem:[#allocation3 + $0x208] sm:$0xff] }
 0x34a   : > { %2717 = vmatpush.bf16.msrb.mxu1 %v4891_v36 }
 0x34b   : > { %v2058_v33 = vmax.f32 %v2022_v43, 0.0  ;;  %v4907_v43 = vld [vmem:[#allocation3 + $0x200] sm:$0xff] }
 0x34c   : > { %v1678_v31 = vpop.f32.mrf.mxu3 }
 0x34d   : > { %v1679_v57 = vadd.f32 %v1678_v31, %v5992_v55  ;;  %v1899_v31 = vpop.f32.mrf.mxu1 }
 0x34e   : > { %v2297_v0 = vpop.f32.mrf.mxu0 }
 0x34f   : > { %v1982_v2 = vadd.f32 %v1884_v44, %v1679_v57  ;;  %v4930_v44 = vld [vmem:[#allocation3 + $0x2b8] sm:$0xff]  ;;  %v4924_v0 = vld [vmem:[#allocation3 + $0x288] sm:$0xff] }
 0x350   : > { %3026 = vmatpush.bf16.msra.mxu1 %v4930_v44 }
 0x351   : > { %v2024_v9 = vadd.f32 %v6111_v63, %v1982_v2 }
 0x353   : > { %v2060_v54 = vmax.f32 %v2024_v9, 0.0  ;;  %v4946_v9 = vld [vmem:[#allocation3 + $0x338] sm:$0xff] }
 0x354   : > { %v1681_v49 = vpop.f32.mrf.mxu3  ;;  %3027 = vmatpush.bf16.msra.mxu1 %v4929_v40 }
 0x355   : > { %v2092_v16 = vmax.f32 %v2058_v33, %v2060_v54  ;;  %v1682_v14 = vadd.f32 %v1681_v49, %v6001_v37  ;;  %v4923_v54 = vld [vmem:[#allocation3 + $0x280] sm:$0xff] }
 0x356   : > { %v6126_v17 = vpop.f32.mrf.mxu0 }
 0x357   : > { %v2142_v55 = vpack.c.bf16 %v2092_v16, %v2092_v16  ;;  %v1984_v20 = vadd.f32 %v1887_v60, %v1682_v14  ;;  %v4962_v14 = vld [vmem:[#allocation3 + $0x3b8] sm:$0xff] }
 0x358   : > { %3028 = vmatpush.bf16.msra.mxu1 %v4928_v8 }
 0x359   : > { %2281 = vmatmul.bf16.vlgmr.msrb.gmra.mxu3 %v2142_v55  ;;  %v2026_v7 = vadd.f32 %v6111_v63, %v1984_v20  ;;  %v1902_v55 = vpop.f32.mrf.mxu1 }
 0x35a   : > { %2868 = vmatpush.bf16.msrb.mxu3 %v4914_v18  ;;  %v4945_v18 = vld [vmem:[#allocation3 + $0x330] sm:$0xff] }
 0x35b   : > { %v2062_v24 = vmax.f32 %v2026_v7, 0.0  ;;  %v4960_v7 = vld [vmem:[#allocation3 + $0x3a8] sm:$0xff] }
 0x35c   : > { %v1683_v38 = vpop.f32.mrf.mxu3 }
 0x35d   : > { %v1684_v23 = vadd.f32 %v1683_v38, %v6004_v42  ;;  %v4927_v42 = vld [vmem:[#allocation3 + $0x2a0] sm:$0xff]  ;;  %v4961_v38 = vld [vmem:[#allocation3 + $0x3b0] sm:$0xff] }
 0x35e   : > { %v2576_v62 = vpop.f32.mrf.mxu0  ;;  %2869 = vmatpush.bf16.msrb.mxu3 %v4913_v10  ;;  %3029 = vmatpush.bf16.msra.mxu1 %v4927_v42  ;;  %v4944_v10 = vld [vmem:[#allocation3 + $0x328] sm:$0xff]  ;;  %v4958_v42 = vld [vmem:[#allocation3 + $0x398] sm:$0xff] }
 0x35f   : > { %v1986_v11 = vadd.f32 %v1889_v58, %v1684_v23 }
 0x361   : > { %v2028_v37 = vadd.f32 %v6111_v63, %v1986_v11  ;;  %v1904_v11 = vpop.f32.mrf.mxu1 }
 0x362   : > { %2870 = vmatpush.bf16.msrb.mxu3 %v4912_v28  ;;  %3030 = vmatpush.bf16.msra.mxu1 %v4926_v51 }
 0x363   : > { %v2064_v1 = vmax.f32 %v2028_v37, 0.0 }
 0x364   : > { %v1686_v60 = vpop.f32.mrf.mxu3 }
 0x365   : > { %v2094_v41 = vmax.f32 %v2062_v24, %v2064_v1  ;;  %v1687_v30 = vadd.f32 %v1686_v60, %v6012_v46 }
 0x366   : > { %2871 = vmatpush.bf16.msrb.mxu3 %v4911_v32  ;;  %3031 = vmatpush.bf16.msra.mxu1 %v4925_v13  ;;  %v4942_v32 = vld [vmem:[#allocation3 + $0x318] sm:$0xff] }
 0x367   : > { %v2421_v48 = vpack.c.bf16 %v2094_v41, %v2094_v41  ;;  %v1988_v47 = vadd.f32 %v1892_v4, %v1687_v30  ;;  %v4941_v41 = vld [vmem:[#allocation3 + $0x310] sm:$0xff] }
 0x369   : > { %2560 = vmatmul.bf16.vlgmr.msra.gmra.mxu3 %v2421_v48  ;;  %v2030_v57 = vadd.f32 %v6111_v63, %v1988_v47  ;;  %v4940_v48 = vld [vmem:[#allocation3 + $0x308] sm:$0xff] }
 0x36a   : > { %2872 = vmatpush.bf16.msrb.mxu3 %v4910_v3  ;;  %3032 = vmatpush.bf16.msra.mxu1 %v4924_v0 }
 0x36b   : > { %v2066_v2 = vmax.f32 %v2030_v57, 0.0  ;;  %v4956_v57 = vld [vmem:[#allocation3 + $0x388] sm:$0xff] }
 0x36c   : > { %v1688_v58 = vpop.f32.mrf.mxu3  ;;  %v6133_v52 = vpop.f32.mrf.mxu2 }
 0x36d   : > { %v1689_v5 = vadd.f32 %v1688_v58, %v6015_v34  ;;  %v4957_v58 = vld [vmem:[#allocation3 + $0x390] sm:$0xff] }
 0x36e   : > { %2873 = vmatpush.bf16.msrb.mxu3 %v4909_v6  ;;  %3033 = vmatpush.bf16.msra.mxu1 %v4923_v54  ;;  %v1907_v6 = vpop.f32.mrf.mxu1  ;;  %v4976_v54 = vld [vmem:[#allocation3 + $0x428] sm:$0xff] }
 0x36f   : > { %v1990_v12 = vadd.f32 %v1894_v19, %v1689_v5 }
 0x371   : > { %v2032_v46 = vadd.f32 %v6111_v63, %v1990_v12 }
 0x372   : > { %2874 = vmatpush.bf16.msrb.mxu3 %v4908_v56  ;;  %v4978_v56 = vld [vmem:[#allocation3 + $0x438] sm:$0xff] }
 0x373   : > { %v2068_v4 = vmax.f32 %v2032_v46, 0.0 }
 0x374   : > { %v1691_v26 = vpop.f32.mrf.mxu3  ;;  %v2734_v33 = vpop.f32.mrf.mxu2 }
 0x375   : > { %v2096_v34 = vmax.f32 %v2066_v2, %v2068_v4  ;;  %v1692_v36 = vadd.f32 %v1691_v26, %v6023_v50  ;;  %v4943_v50 = vld [vmem:[#allocation3 + $0x320] sm:$0xff]  ;;  %v4977_v2 = vld [vmem:[#allocation3 + $0x430] sm:$0xff] }
 0x376   : > { %v6138_v49 = vpop.f32.mrf.mxu0  ;;  %2875 = vmatpush.bf16.msrb.mxu3 %v4907_v43  ;;  %v4955_v4 = vld [vmem:[#allocation3 + $0x380] sm:$0xff]  ;;  %v1909_v26 = vpop.f32.mrf.mxu1 }
 0x377   : > { %v2579_v16 = vpack.c.bf16 %v2096_v34, %v2096_v34  ;;  %v1992_v44 = vadd.f32 %v1897_v21, %v1692_v36 }
 0x379   : > { %2718 = vmatmul.bf16.vlgmr.msrb.gmra.mxu1 %v2579_v16  ;;  %v2034_v40 = vadd.f32 %v6111_v63, %v1992_v44 }
 0x37a   : > { %3184 = vmatpush.bf16.msra.mxu3 %v4946_v9  ;;  %3342 = vmatpush.bf16.msrb.mxu1 %v4962_v14 }
 0x37b   : > { %v2070_v37 = vmax.f32 %v2034_v40, 0.0 }
 0x37c   : > { %v1693_v19 = vpop.f32.mrf.mxu3 }
 0x37d   : > { %v1694_v20 = vadd.f32 %v1693_v19, %v6026_v39  ;;  %v4959_v39 = vld [vmem:[#allocation3 + $0x3a0] sm:$0xff]  ;;  %v4974_v19 = vld [vmem:[#allocation3 + $0x418] sm:$0xff] }
 0x37e   : > { %3185 = vmatpush.bf16.msra.mxu3 %v4945_v18  ;;  %v2892_v23 = vpop.f32.mrf.mxu0  ;;  %3343 = vmatpush.bf16.msrb.mxu1 %v4961_v38  ;;  %v4975_v18 = vld [vmem:[#allocation3 + $0x420] sm:$0xff] }
 0x37f   : > { %v1994_v62 = vadd.f32 %v1899_v31, %v1694_v20  ;;  %v1912_v20 = vpop.f32.mrf.mxu1 }
 0x381   : > { %v2036_v28 = vadd.f32 %v6111_v63, %v1994_v62  ;;  %v4973_v62 = vld [vmem:[#allocation3 + $0x410] sm:$0xff] }
 0x382   : > { %3186 = vmatpush.bf16.msra.mxu3 %v4944_v10  ;;  %3344 = vmatpush.bf16.msrb.mxu1 %v4960_v7 }
 0x383   : > { %v2072_v8 = vmax.f32 %v2036_v28, 0.0 }
 0x384   : > { %v1696_v24 = vpop.f32.mrf.mxu3 }
 0x385   : > { %v2098_v1 = vmax.f32 %v2070_v37, %v2072_v8  ;;  %v1697_v21 = vadd.f32 %v1696_v24, %v6034_v35  ;;  %v4939_v35 = vld [vmem:[#allocation3 + $0x300] sm:$0xff] }
 0x386   : > { %3187 = vmatpush.bf16.msra.mxu3 %v4943_v50  ;;  %3345 = vmatpush.bf16.msrb.mxu1 %v4959_v39  ;;  %v4971_v24 = vld [vmem:[#allocation3 + $0x400] sm:$0xff] }
 0x387   : > { %v2737_v60 = vpack.c.bf16 %v2098_v1, %v2098_v1  ;;  %v1996_v3 = vadd.f32 %v1902_v55, %v1697_v21 }
 0x389   : > { %2876 = vmatmul.bf16.vlgmr.msrb.gmra.mxu3 %v2737_v60  ;;  %v2038_v5 = vadd.f32 %v6111_v63, %v1996_v3 }
 0x38a   : > { %3188 = vmatpush.bf16.msra.mxu3 %v4942_v32  ;;  %3346 = vmatpush.bf16.msrb.mxu1 %v4958_v42 }
 0x38b   : > { %v2074_v12 = vmax.f32 %v2038_v5, 0.0 }
 0x38c   : > { %v1698_v30 = vpop.f32.mrf.mxu3  ;;  %v6145_v51 = vpop.f32.mrf.mxu2 }
 0x38d   : > { %v1699_v47 = vadd.f32 %v1698_v30, %v6037_v53 }
 0x38e   : > { %3189 = vmatpush.bf16.msra.mxu3 %v4941_v41  ;;  %3347 = vmatpush.bf16.msrb.mxu1 %v4957_v58 }
 0x38f   : > { %v1998_v13 = vadd.f32 %v1904_v11, %v1699_v47  ;;  %v1914_v11 = vpop.f32.mrf.mxu1 }
 0x391   : > { %v2040_v31 = vadd.f32 %v6111_v63, %v1998_v13 }
 0x392   : > { %3190 = vmatpush.bf16.msra.mxu3 %v4940_v48  ;;  %3348 = vmatpush.bf16.msrb.mxu1 %v4956_v57 }
 0x393   : > { %v2076_v46 = vmax.f32 %v2040_v31, 0.0 }
 0x394   : > { %v1701_v0 = vpop.f32.mrf.mxu3  ;;  %v3050_v43 = vpop.f32.mrf.mxu2 }
 0x395   : > { %v2100_v53 = vmax.f32 %v2074_v12, %v2076_v46  ;;  %v1702_v34 = vadd.f32 %v1701_v0, %v6045_v59 }
 0x396   : > { %3191 = vmatpush.bf16.msra.mxu3 %v4939_v35  ;;  %v6150_v9 = vpop.f32.mrf.mxu0  ;;  %3349 = vmatpush.bf16.msrb.mxu1 %v4955_v4 }
 0x397   : > { %v2895_v33 = vpack.c.bf16 %v2100_v53, %v2100_v53  ;;  %v2000_v16 = vadd.f32 %v1907_v6, %v1702_v34  ;;  %v1917_v41 = vpop.f32.mrf.mxu1 }
 0x399   : > { %3034 = vmatmul.bf16.vlgmr.msra.gmra.mxu1 %v2895_v33  ;;  %v2042_v44 = vadd.f32 %v6111_v63, %v2000_v16 }
 0x39a   : > { %3500 = vmatpush.bf16.msrb.mxu3 %v4978_v56 }
 0x39b   : > { %v2078_v59 = vmax.f32 %v2042_v44, 0.0 }
 0x39c   : > { %v1703_v36 = vpop.f32.mrf.mxu3 }
 0x39d   : > { %v1704_v55 = vadd.f32 %v1703_v36, %v6048_v61  ;;  %v4972_v61 = vld [vmem:[#allocation3 + $0x408] sm:$0xff] }
 0x39e   : > { %3501 = vmatpush.bf16.msrb.mxu3 %v4977_v2  ;;  %v3208_v14 = vpop.f32.mrf.mxu0 }
 0x39f   : > { %v2002_v10 = vadd.f32 %v1909_v26, %v1704_v55  ;;  %v1919_v35 = vpop.f32.mrf.mxu1 }
 0x3a1   : > { %v2044_v38 = vadd.f32 %v6111_v63, %v2002_v10 }
 0x3a2   : > { %3502 = vmatpush.bf16.msrb.mxu3 %v4976_v54 }
 0x3a3   : > { %v2080_v23 = vmax.f32 %v2044_v38, 0.0  ;;  %v4991_v38 = vld [vmem:[%s6275_s7 + $0x20] sm:$0xff] }
 0x3a4   : > { %v1706_v40 = vpop.f32.mrf.mxu3 }
 0x3a5   : > { %v2102_v50 = vmax.f32 %v2078_v59, %v2080_v23  ;;  %v1707_v7 = vadd.f32 %v1706_v40, %v6057_v15  ;;  %v4990_v59 = vld [vmem:[%s6275_s7 + $0x18] sm:$0xff]  ;;  %v4989_v23 = vld [vmem:[%s6275_s7 + $0x10] sm:$0xff] }
 0x3a6   : > { %3503 = vmatpush.bf16.msrb.mxu3 %v4975_v18 }
 0x3a7   : > { %v3053_v28 = vpack.c.bf16 %v2102_v50, %v2102_v50  ;;  %v2004_v37 = vadd.f32 %v1912_v20, %v1707_v7  ;;  %v4987_v50 = vld [vmem:[%s6275_s7] sm:$0xff] }
 0x3a9   : > { %3192 = vmatmul.bf16.vlgmr.msra.gmra.mxu3 %v3053_v28  ;;  %v2046_v39 = vadd.f32 %v6111_v63, %v2004_v37  ;;  %v5000_v37 = vld [vmem:[%s6277_s9 + $0x28] sm:$0xff] }
 0x3aa   : > { %3504 = vmatpush.bf16.msrb.mxu3 %v4974_v19 }
 0x3ab   : > { %v2082_v15 = vmax.f32 %v2046_v39, 0.0 }
 0x3ac   : > { %v1708_v8 = vpop.f32.mrf.mxu3  ;;  %v6157_v32 = vpop.f32.mrf.mxu2 }
 0x3ad   : > { %v1709_v1 = vadd.f32 %v1708_v8, %v6059_v22 }
 0x3ae   : > { %3505 = vmatpush.bf16.msrb.mxu3 %v4973_v62  ;;  %v4988_v62 = vld [vmem:[%s6275_s7 + $0x8] sm:$0xff] }
 0x3af   : > { %v2006_v60 = vadd.f32 %v1914_v11, %v1709_v1  ;;  %v5001_v11 = vld [vmem:[%s6277_s9 + $0x30] sm:$0xff] }
 0x3b1   : > { %v2048_v21 = vadd.f32 %v6111_v63, %v2006_v60  ;;  %v4998_v60 = vld [vmem:[%s6277_s9 + $0x18] sm:$0xff] }
 0x3b2   : > { %3506 = vmatpush.bf16.msrb.mxu3 %v4972_v61  ;;  %v5002_v61 = vld [vmem:[%s6277_s9 + $0x38] sm:$0xff] }
 0x3b3   : > { %v2084_v42 = vmax.f32 %v2048_v21, 0.0  ;;  %3685 = vmatpush.bf16.msra.mxu2 %v5002_v61 }
 0x3b4   : > { %v1711_v3 = vpop.f32.mrf.mxu3  ;;  %v3366_v48 = vpop.f32.mrf.mxu2 }
 0x3b5   : > { %v2104_v30 = vmax.f32 %v2082_v15, %v2084_v42  ;;  %v1712_v58 = vadd.f32 %v1711_v3, %v6062_v29  ;;  %v4997_v3 = vld [vmem:[%s6277_s9 + $0x10] sm:$0xff] }
 0x3b6   : > { %3507 = vmatpush.bf16.msrb.mxu3 %v4971_v24  ;;  %v6162_v6 = vpop.f32.mrf.mxu0  ;;  %v4999_v24 = vld [vmem:[%s6277_s9 + $0x20] sm:$0xff] }
 0x3b7   : > { %v3211_v47 = vpack.c.bf16 %v2104_v30, %v2104_v30  ;;  %v2008_v5 = vadd.f32 %v1917_v41, %v1712_v58  ;;  %3686 = vmatpush.bf16.msra.mxu2 %v5001_v11 }
 0x3b9   : > { %3350 = vmatmul.bf16.vlgmr.msrb.gmra.mxu1 %v3211_v47  ;;  %v2050_v31 = vadd.f32 %v6111_v63, %v2008_v5  ;;  %v5058_v47 = vld [vmem:[%s6274_s6] ss:$0 sm:$0xff] }
 0x3bb   : > { %v2086_v46 = vmax.f32 %v2050_v31, 0.0  ;;  %3687 = vmatpush.bf16.msra.mxu2 %v5000_v37 }
 0x3bc   : > { %v1713_v22 = vpop.f32.mrf.mxu3 }
 0x3bd   : > { %v1714_v13 = vadd.f32 %v1713_v22, %v6064_v45 }
 0x3be   : > { %v3524_v56 = vpop.f32.mrf.mxu0 }
 0x3bf   : > { %v2010_v57 = vadd.f32 %v1919_v35, %v1714_v13  ;;  %3688 = vmatpush.bf16.msra.mxu2 %v4999_v24  ;;  %v4996_v13 = vld [vmem:[%s6277_s9 + $0x8] sm:$0xff]  ;;  %v5059_v35 = vld [vmem:[%s6276_s8] ss:$0 sm:$0xff] }
 0x3c1   : > { %v2052_v12 = vadd.f32 %v6111_v63, %v2010_v57 }
 0x3c3   : > { %v2088_v0 = vmax.f32 %v2052_v12, 0.0  ;;  %3689 = vmatpush.bf16.msra.mxu2 %v4998_v60 }
 0x3c5   : > { %v2106_v43 = vmax.f32 %v2086_v46, %v2088_v0  ;;  %v5060_v0 = vld [vmem:[%s6278_s10] ss:$0 sm:$0xff] }
 0x3c6   : > { %v2404_v2 = vpop.f32.mrf.mxu1 }
 0x3c7   : > { %v3369_v53 = vpack.c.bf16 %v2106_v43, %v2106_v43  ;;  %3690 = vmatpush.bf16.msra.mxu2 %v4997_v3 }
 0x3c9   : > { %3508 = vmatmul.bf16.vlgmr.msrb.gmra.mxu3 %v3369_v53 }
 0x3cb   : > { %3691 = vmatpush.bf16.msra.mxu2 %v4996_v13 }
 0x3ce   : > { %v2406_v4 = vpop.f32.mrf.mxu1 }
 0x3dc   : > { %v2282_v29 = vpop.f32.mrf.mxu3 }
 0x3dd   : > { %v2296_v26 = vadd.f32 %v6119_v25, %v2282_v29  ;;  %v4994_v25 = vld [vmem:[%s6275_s7 + $0x38] sm:$0xff] }
 0x3de   : > { %3602 = vmatpush.bf16.msra.mxu1 %v4994_v25 }
 0x3df   : > { %v2405_v33 = vadd.f32 %v2404_v2, %v2296_v26 }
 0x3e1   : > { %v2418_v54 = vadd.f32 %v6113_v27, %v2405_v33  ;;  %v4993_v27 = vld [vmem:[%s6275_s7 + $0x30] sm:$0xff] }
 0x3e2   : > { %3603 = vmatpush.bf16.msra.mxu1 %v4993_v27 }
 0x3e4   : > { %v2284_v34 = vpop.f32.mrf.mxu3 }
 0x3ec   : > { %v2561_v45 = vpop.f32.mrf.mxu3 }
 0x3ed   : > { %v2575_v16 = vadd.f32 %v6126_v17, %v2561_v45 }
 0x3ef   : > { %v2578_v36 = vadd.f32 %v2575_v16, %v2418_v54 }
 0x3f4   : > { %v2563_v18 = vpop.f32.mrf.mxu3 }
 0x3f6   : > { %v2719_v63 = vpop.f32.mrf.mxu1 }
 0x3f7   : > { %v2733_v55 = vadd.f32 %v6133_v52, %v2719_v63  ;;  %v4992_v52 = vld [vmem:[%s6275_s7 + $0x28] sm:$0xff] }
 0x3f8   : > { %3604 = vmatpush.bf16.msra.mxu1 %v4992_v52 }
 0x3f9   : > { %v2736_v14 = vadd.f32 %v2733_v55, %v2578_v36 }
 0x3fc   : > { %3605 = vmatpush.bf16.msra.mxu1 %v4991_v38 }
 0x3fe   : > { %v2721_v44 = vpop.f32.mrf.mxu1 }
 0x400   : > { %3606 = vmatpush.bf16.msra.mxu1 %v4990_v59 }
 0x404   : > { %3607 = vmatpush.bf16.msra.mxu1 %v4989_v23 }
 0x408   : > { %3608 = vmatpush.bf16.msra.mxu1 %v4988_v62 }
 0x40c   : > { %v2877_v10 = vpop.f32.mrf.mxu3  ;;  %3609 = vmatpush.bf16.msra.mxu1 %v4987_v50 }
 0x40d   : > { %v2891_v1 = vadd.f32 %v6138_v49, %v2877_v10 }
 0x40f   : > { %v2894_v21 = vadd.f32 %v2891_v1, %v2736_v14 }
 0x414   : > { %v2879_v19 = vpop.f32.mrf.mxu3 }
 0x416   : > { %v3035_v20 = vpop.f32.mrf.mxu1 }
 0x417   : > { %v3049_v39 = vadd.f32 %v6145_v51, %v3035_v20 }
 0x419   : > { %v3052_v15 = vadd.f32 %v3049_v39, %v2894_v21 }
 0x41e   : > { %v3037_v17 = vpop.f32.mrf.mxu1 }
 0x42c   : > { %v3193_v40 = vpop.f32.mrf.mxu3 }
 0x42d   : > { %v3207_v41 = vadd.f32 %v6150_v9, %v3193_v40 }
 0x42f   : > { %v3210_v48 = vadd.f32 %v3207_v41, %v3052_v15 }
 0x434   : > { %v3195_v28 = vpop.f32.mrf.mxu3 }
 0x436   : > { %v3351_v7 = vpop.f32.mrf.mxu1 }
 0x437   : > { %v3365_v42 = vadd.f32 %v6157_v32, %v3351_v7 }
 0x439   : > { %v3368_v30 = vadd.f32 %v3365_v42, %v3210_v48 }
 0x43e   : > { %v3353_v8 = vpop.f32.mrf.mxu1 }
 0x44c   : > { %v3509_v49 = vpop.f32.mrf.mxu3 }
 0x44d   : > { %v3523_v51 = vadd.f32 %v6162_v6, %v3509_v49  ;;  %v4995_v6 = vld [vmem:[%s6277_s9] sm:$0xff] }
 0x44e   : > { %3692 = vmatpush.bf16.msra.mxu2 %v4995_v6 }
 0x44f   : > { %v3526_v58 = vadd.f32 %v3523_v51, %v3368_v30 }
 0x451   : > { %v3531_v9 = vadd.f32 %v5058_v47, %v3526_v58 }
 0x453   : > { %v3532_v5 = vmax.f32 %v3531_v9, 0.0 }
 0x454   : > { %v3511_v32 = vpop.f32.mrf.mxu3 }
 0x455   : > { %v3533_v22 = vpack.c.bf16 %v3532_v5, %v3532_v5 }
 0x457   : > { %3610 = vmatmul.bf16.vlgmr.msra.gmra.mxu1 %v3533_v22 }
 0x4d4   : > { %v3611_v56 = vpop.f32.mrf.mxu1 }
 0x4d5   : > { %v3612_v31 = vadd.f32 %v5059_v35, %v3611_v56 }
 0x4d7   : > { %v3615_v57 = vmax.f32 %v3612_v31, 0.0 }
 0x4d9   : > { %v3616_v12 = vpack.c.bf16 %v3615_v57, %v3615_v57 }
 0x4db   : > { %3693 = vmatmul.bf16.vlgmr.msra.gmra.mxu2 %v3616_v12 }
 0x4dc   : > { %v3613_v46 = vpop.f32.mrf.mxu1 }
 0x55e   : > { %v3694_v43 = vpop.f32.mrf.mxu2 }
 0x55f   : > { %v3695_v2 = vadd.f32 %v5060_v0, %v3694_v43 }
 0x561   : > { %3698 = vst [vmem:[%s600_s16] sm:$0xff] %v3695_v2 }
 0x562   : > { %5119 = shalt.err (!%p5116_p9)
}
 0x563   : > { %5009 = dma.vmem_to_hbm [thread:$0]  (%p5266_p6), %s3713_s25, 128, %s3715_s12, %s3700_s13  }
 0x566   : > { %v3696_v53 = vpop.f32.mrf.mxu2 }
 0x567 PF: > { %s3726_s5 = sand.u32 1, %s5146_s17   ;;  %p5016_p11 = pnand %p3795_p1, %p5272_p10 }
 0x568   : > { %s3727_s30 = scalar_lea.sflag [#allocation5], %s3726_s5 }
 0x569   : > { %p5017_p12 = pneg %p5016_p11 }
 0x56b   : > { %5141 = dma.done.wait (%p5017_p12), %s3727_s30, 128  }
 0x56c   : > { %5143 = vsyncadd (%p5017_p12), %s3727_s30, 4294967168  ;;  %s6289_s0 = sld [smem:[#allocation9_spill]]  ;;  %p22_p13 = scmp.ge.s32.totalorder %s5248_s23, 4  }
 0x56d   : > { %s6290_s17 = smov %s5150_s18  ;;  %s6291_s18 = smov %s5154_s19 }
 0x56e   : > { %s6293_s20 = smov %s5248_s23  ;;  %24 = sbr.rel (!%p22_p13) target bundleno = 7 (0x7), region = 159 }
 0x572   : > { %s6292_s19 = smov %s6289_s0 }
 0x573   :  { %3733 = vsyncpa [#allocation4], 1 }
 0x574   :  { %3735 = vsyncpa [#allocation4 + $0x1], 1 }
 0x575   :  { %3736 = vsyncpa [#allocation5], 1 }
 0x576   :  { %3738 = vsyncpa [#allocation5 + $0x1], 1 }

</bundles_post_ra>
